<compile_context>
chip_gen: v7x
topology: tpu7x:2x2x1
jax: 0.10.0
libtpu: 0.0.40
codegen_flags: <defaults>
</compile_context>

<pallas_src>
import functools

import jax
import jax.numpy as jnp
from jax.experimental import pallas as pl
from jax.experimental.pallas import tpu as pltpu


CFG = dict(vocab=64, d_model=32, n_heads=2, n_layers=2, d_ff=64, max_pos=8)


# ----------------------------- fused decoder kernel -----------------------------

def _fused_decoder_kernel(
    x_ref, bias_ref, wd_ref, wf_ref, vec_ref, head_w_ref, o_ref,
    *, n_layers, n_heads, d_model, d_head, d_ff, wsub, v_pad):
  """Whole decoder forward on VMEM-resident packed slabs.

  x_ref    : [BS, D]  f32 activations.
  bias_ref : [BS, BS] f32 additive attention bias (causal + key padding +
             block-diagonal so tokens never attend across batch rows).
  wd_ref   : [L, D, 3*wsub] bf16, per layer [ qkv_w(scale-folded) | proj_w | fc1_w ],
             each sub-block starting at a 128-aligned lane offset.
  wf_ref   : [L, F, D] bf16 fc2 weights.
  vec_ref  : [L+1, 8, W] f32; rows per layer: ln1_g, ln1_b, ln2_g, ln2_b,
             qkv_b, proj_b, fc1_b, fc2_b.  Block L: lnf_g, lnf_b, head_b.
  head_w_ref: [D, v_pad] bf16 lm_head weight (vocab padded to 128 lanes).
  """
  D, Dh, F, H = d_model, d_head, d_ff, n_heads
  bf16 = jnp.bfloat16

  def layer_norm(x, g, b):
    mean = jnp.mean(x, axis=-1, keepdims=True)
    var = jnp.mean(jnp.square(x - mean), axis=-1, keepdims=True)
    return (x - mean) * jax.lax.rsqrt(var + 1e-5) * g + b

  x = x_ref[...]          # [BS, D] f32
  bias = bias_ref[...]    # [BS, BS] f32

  for l in range(n_layers):
    wl = wd_ref[l]        # [D, 3*wsub] bf16
    vl = vec_ref[l]       # [8, W] f32
    qkv_w = wl[:, 0:3 * D]
    proj_w = wl[:, wsub:wsub + D]
    fc1_w = wl[:, 2 * wsub:2 * wsub + F]
    fc2_w = wf_ref[l]     # [F, D] bf16

    ln1_g, ln1_b = vl[0:1, :D], vl[1:2, :D]
    ln2_g, ln2_b = vl[2:3, :D], vl[3:4, :D]
    qkv_b = vl[4:5, :3 * D]
    proj_b = vl[5:6, :D]
    fc1_b = vl[6:7, :F]
    fc2_b = vl[7:8, :D]

    # ---- attention: one fused QKV matmul, per-head softmax, one proj matmul ----
    h = layer_norm(x, ln1_g, ln1_b)
    qkv = jnp.dot(h.astype(bf16), qkv_w,
                  preferred_element_type=jnp.float32) + qkv_b        # [BS, 3D]
    heads = []
    for hh in range(H):
      # 1/sqrt(Dh) already folded into the Q weight columns in the wrapper.
      q_h = qkv[:, hh * Dh:(hh + 1) * Dh]
      k_h = qkv[:, D + hh * Dh:D + (hh + 1) * Dh]
      v_h = qkv[:, 2 * D + hh * Dh:2 * D + (hh + 1) * Dh]
      s = jax.lax.dot_general(q_h.astype(bf16), k_h.astype(bf16),
                              (((1,), (1,)), ((), ())),
                              preferred_element_type=jnp.float32)
      s = s + bias
      m = jnp.max(s, axis=-1, keepdims=True)
      e = jnp.exp(s - m)
      p = e * pl.reciprocal(jnp.sum(e, axis=-1, keepdims=True), approx=True)
      heads.append(jnp.dot(p.astype(bf16), v_h.astype(bf16),
                           preferred_element_type=jnp.float32))
    attn = jnp.concatenate(heads, axis=-1)                           # [BS, D]
    attn = jnp.dot(attn.astype(bf16), proj_w,
                   preferred_element_type=jnp.float32) + proj_b
    x = x + attn

    # ---- MLP ----
    h = layer_norm(x, ln2_g, ln2_b)
    h = jnp.dot(h.astype(bf16), fc1_w, preferred_element_type=jnp.float32) + fc1_b
    h = jax.nn.gelu(h, approximate=True)
    h = jnp.dot(h.astype(bf16), fc2_w, preferred_element_type=jnp.float32) + fc2_b
    x = x + h

  vf = vec_ref[n_layers]
  lnf_g, lnf_b, head_b = vf[0:1, :D], vf[1:2, :D], vf[2:3, :v_pad]
  x = layer_norm(x, lnf_g, lnf_b)
  logits = jnp.dot(x.astype(bf16), head_w_ref[...],
                   preferred_element_type=jnp.float32) + head_b      # [BS, v_pad]
  o_ref[...] = logits            # full-lane (128-multiple) unmasked store


# ----------------------------- params -----------------------------

def init_params(key, cfg=CFG):
  D, V, F, L, P = cfg["d_model"], cfg["vocab"], cfg["d_ff"], cfg["n_layers"], cfg["max_pos"]
  keys = iter(jax.random.split(key, 4 + L * 4))
  std = 0.02

  def dense(k, din, dout):
    return (std * jax.random.normal(k, (din, dout), jnp.float32),
            jnp.zeros((1, dout), jnp.float32))

  params = {
      "tok_emb": std * jax.random.normal(next(keys), (V, D), jnp.float32),
      "pos_emb": std * jax.random.normal(next(keys), (P, D), jnp.float32),
      "ln_f": (jnp.ones((1, D), jnp.float32), jnp.zeros((1, D), jnp.float32)),
      "lm_head": dense(next(keys), D, V),
      "layers": [],
  }
  for _ in range(L):
    layer = {
        "ln1": (jnp.ones((1, D), jnp.float32), jnp.zeros((1, D), jnp.float32)),
        "qkv": dense(next(keys), D, 3 * D),
        "proj": dense(next(keys), D, D),
        "ln2": (jnp.ones((1, D), jnp.float32), jnp.zeros((1, D), jnp.float32)),
        "fc1": dense(next(keys), D, F),
        "fc2": dense(next(keys), F, D),
    }
    params["layers"].append(layer)
  return params


# ----------------------------- forward wrapper -----------------------------

def _stack(layers, name, idx):
  return jnp.stack([layer[name][idx] for layer in layers], axis=0)


def _pad_lanes(a, width):
  pad = [(0, 0)] * (a.ndim - 1) + [(0, width - a.shape[-1])]
  return jnp.pad(a, pad)


def text_generation_forward(params, input_ids, attention_mask, cfg=CFG):
  """Returns logits [B, S, vocab] (float32), mirroring model(...).logits."""
  B, S = input_ids.shape
  D, H, L = cfg["d_model"], cfg["n_heads"], cfg["n_layers"]
  V, F = cfg["vocab"], cfg["d_ff"]
  Dh = D // H
  BS = B * S
  assert S <= cfg["max_pos"], "sequence length exceeds max_pos"
  layers = params["layers"]

  # TODO(synk): token-embedding gather has no clean Pallas equivalent at this
  # size; the gather + positional add stay as one XLA op feeding the fused kernel.
  x = jnp.take(params["tok_emb"], input_ids, axis=0) + params["pos_emb"][:S][None, :, :]
  x = x.reshape(BS, D).astype(jnp.float32)

  # Additive attention bias over the flattened token axis:
  # allowed iff same batch row AND causal AND key not padded.
  # TODO(synk): at large B*S build this mask in-kernel from per-token vectors
  # instead of materializing the O((B*S)^2) slab (matters on v7x 64 MiB VMEM).
  batch_idx = jnp.repeat(jnp.arange(B, dtype=jnp.int32), S)
  pos_idx = jnp.tile(jnp.arange(S, dtype=jnp.int32), B)
  same_batch = batch_idx[:, None] == batch_idx[None, :]
  causal = pos_idx[None, :] <= pos_idx[:, None]
  key_keep = (attention_mask.reshape(-1).astype(jnp.int32) > 0)[None, :]
  allowed = jnp.logical_and(jnp.logical_and(same_batch, causal), key_keep)
  # NOTE: fully padded query rows get a uniform softmax (finite, ignored logits).
  bias = jnp.where(allowed, 0.0, -1e9).astype(jnp.float32)            # [BS, BS]

  # ---- one-time XLA-side weight re-layout into a few packed slabs ----
  scale = 1.0 / (Dh ** 0.5)
  WSUB = 128 * ((max(3 * D, F, D) + 127) // 128)      # 128-aligned sub-block width
  Vp = 128 * ((V + 127) // 128)                       # vocab padded to lane width
  VEC_W = max(128, WSUB, Vp)

  qkv_w = _stack(layers, "qkv", 0)                                    # [L, D, 3D]
  qkv_w = jnp.concatenate([qkv_w[:, :, :D] * scale, qkv_w[:, :, D:]], axis=-1)
  proj_w = _stack(layers, "proj", 0)                                  # [L, D, D]
  fc1_w = _stack(layers, "fc1", 0)                                    # [L, D, F]
  fc2_w = _stack(layers, "fc2", 0)                                    # [L, F, D]
  wd = jnp.concatenate([_pad_lanes(qkv_w, WSUB),
                        _pad_lanes(proj_w, WSUB),
                        _pad_lanes(fc1_w, WSUB)], axis=-1).astype(jnp.bfloat16)
  wf = fc2_w.astype(jnp.bfloat16)

  vec_rows = [
      _stack(layers, "ln1", 0), _stack(layers, "ln1", 1),
      _stack(layers, "ln2", 0), _stack(layers, "ln2", 1),
      _stack(layers, "qkv", 1), _stack(layers, "proj", 1),
      _stack(layers, "fc1", 1), _stack(layers, "fc2", 1),
  ]
  vec = jnp.concatenate([_pad_lanes(r, VEC_W) for r in vec_rows], axis=1)  # [L,8,W]
  lnf_g, lnf_b = params["ln_f"]
  head_w, head_b = params["lm_head"]
  fin = jnp.zeros((1, 8, VEC_W), jnp.float32)
  fin = fin.at[0, 0, :D].set(lnf_g[0])
  fin = fin.at[0, 1, :D].set(lnf_b[0])
  fin = fin.at[0, 2, :V].set(head_b[0])
  vec = jnp.concatenate([vec, fin], axis=0).astype(jnp.float32)       # [L+1,8,W]

  head_w_p = _pad_lanes(head_w, Vp).astype(jnp.bfloat16)              # [D, Vp]

  kern = functools.partial(
      _fused_decoder_kernel, n_layers=L, n_heads=H, d_model=D, d_head=Dh,
      d_ff=F, wsub=WSUB, v_pad=Vp)

  vmem = pl.BlockSpec(memory_space=pltpu.MemorySpace.VMEM)
  logits_p = pl.pallas_call(
      kern,
      out_shape=jax.ShapeDtypeStruct((BS, Vp), jnp.float32),
      in_specs=[vmem] * 6,
      out_specs=vmem,
  )(x, bias, wd, wf, vec, head_w_p)
  return logits_p[:, :V].reshape(B, S, V)


# ----------------------------- main -----------------------------

if __name__ == "__main__":
  key = jax.random.PRNGKey(0)
  pkey, dkey = jax.random.split(key)
  params = init_params(pkey)

  B, S = 2, 8
  input_ids = jax.random.randint(dkey, (B, S), 0, CFG["vocab"], dtype=jnp.int32)
  # second sequence has 2 padded positions at the end
  attention_mask = jnp.array(
      [[1, 1, 1, 1, 1, 1, 1, 1],
       [1, 1, 1, 1, 1, 1, 0, 0]], dtype=jnp.int32)

  logits = text_generation_forward(params, input_ids, attention_mask)
  logits = jax.block_until_ready(logits)
  assert logits.shape == (B, S, CFG["vocab"]) and logits.dtype == jnp.float32
  assert bool(jnp.all(jnp.isfinite(logits)))
  print("KERNEL_OK")
</pallas_src>

<mosaic_0001>
module attributes {stable_mosaic.version = 11 : i64} {
  func.func @_fused_decoder_kernel(%arg0: memref<16x32xf32, #tpu.memory_space<vmem>>, %arg1: memref<16x16xf32, #tpu.memory_space<vmem>>, %arg2: memref<2x32x384xbf16, #tpu.memory_space<vmem>>, %arg3: memref<2x64x32xbf16, #tpu.memory_space<vmem>>, %arg4: memref<3x8x128xf32, #tpu.memory_space<vmem>>, %arg5: memref<32x128xbf16, #tpu.memory_space<vmem>>, %arg6: memref<16x128xf32, #tpu.memory_space<vmem>>) attributes {dimension_semantics = [], scalar_prefetch = 0 : i64, scratch_operands = 0 : i64, tpu.core_type = #tpu.core_type<tc>} {
    %c0 = arith.constant 0 : index
    %c0_0 = arith.constant 0 : index
    %0 = vector.load %arg0[%c0, %c0_0] : memref<16x32xf32, #tpu.memory_space<vmem>>, vector<16x32xf32>
    %c0_1 = arith.constant 0 : index
    %c0_2 = arith.constant 0 : index
    %1 = vector.load %arg1[%c0_1, %c0_2] : memref<16x16xf32, #tpu.memory_space<vmem>>, vector<16x16xf32>
    %c0_3 = arith.constant 0 : index
    %c0_4 = arith.constant 0 : index
    %c0_5 = arith.constant 0 : index
    %2 = vector.load %arg2[%c0_3, %c0_4, %c0_5] : memref<2x32x384xbf16, #tpu.memory_space<vmem>>, vector<1x32x384xbf16>
    %3 = vector.shape_cast %2 : vector<1x32x384xbf16> to vector<32x384xbf16>
    %c0_6 = arith.constant 0 : index
    %c0_7 = arith.constant 0 : index
    %c0_8 = arith.constant 0 : index
    %4 = vector.load %arg4[%c0_6, %c0_7, %c0_8] : memref<3x8x128xf32, #tpu.memory_space<vmem>>, vector<1x8x128xf32>
    %5 = vector.shape_cast %4 : vector<1x8x128xf32> to vector<8x128xf32>
    %6 = vector.extract_strided_slice %3 {offsets = [0, 0], sizes = [32, 96], strides = [1, 1]} : vector<32x384xbf16> to vector<32x96xbf16>
    %7 = vector.extract_strided_slice %3 {offsets = [0, 128], sizes = [32, 32], strides = [1, 1]} : vector<32x384xbf16> to vector<32x32xbf16>
    %8 = vector.extract_strided_slice %3 {offsets = [0, 256], sizes = [32, 64], strides = [1, 1]} : vector<32x384xbf16> to vector<32x64xbf16>
    %c0_9 = arith.constant 0 : index
    %c0_10 = arith.constant 0 : index
    %c0_11 = arith.constant 0 : index
    %9 = vector.load %arg3[%c0_9, %c0_10, %c0_11] : memref<2x64x32xbf16, #tpu.memory_space<vmem>>, vector<1x64x32xbf16>
    %10 = vector.shape_cast %9 : vector<1x64x32xbf16> to vector<64x32xbf16>
    %11 = vector.extract_strided_slice %5 {offsets = [0, 0], sizes = [1, 32], strides = [1, 1]} : vector<8x128xf32> to vector<1x32xf32>
    %12 = vector.extract_strided_slice %5 {offsets = [1, 0], sizes = [1, 32], strides = [1, 1]} : vector<8x128xf32> to vector<1x32xf32>
    %13 = vector.extract_strided_slice %5 {offsets = [2, 0], sizes = [1, 32], strides = [1, 1]} : vector<8x128xf32> to vector<1x32xf32>
    %14 = vector.extract_strided_slice %5 {offsets = [3, 0], sizes = [1, 32], strides = [1, 1]} : vector<8x128xf32> to vector<1x32xf32>
    %15 = vector.extract_strided_slice %5 {offsets = [4, 0], sizes = [1, 96], strides = [1, 1]} : vector<8x128xf32> to vector<1x96xf32>
    %16 = vector.extract_strided_slice %5 {offsets = [5, 0], sizes = [1, 32], strides = [1, 1]} : vector<8x128xf32> to vector<1x32xf32>
    %17 = vector.extract_strided_slice %5 {offsets = [6, 0], sizes = [1, 64], strides = [1, 1]} : vector<8x128xf32> to vector<1x64xf32>
    %18 = vector.extract_strided_slice %5 {offsets = [7, 0], sizes = [1, 32], strides = [1, 1]} : vector<8x128xf32> to vector<1x32xf32>
    %cst = arith.constant dense<0.000000e+00> : vector<16xf32>
    %19 = vector.multi_reduction <add>, %0, %cst [1] : vector<16x32xf32> to vector<16xf32>
    %20 = vector.shape_cast %19 : vector<16xf32> to vector<16x1xf32>
    %cst_12 = arith.constant 3.200000e+01 : f32
    %21 = vector.broadcast %cst_12 : f32 to vector<16x1xf32>
    %22 = arith.divf %20, %21 : vector<16x1xf32>
    %23 = vector.broadcast %22 : vector<16x1xf32> to vector<16x32xf32>
    %24 = arith.subf %0, %23 : vector<16x32xf32>
    %25 = arith.mulf %24, %24 : vector<16x32xf32>
    %cst_13 = arith.constant dense<0.000000e+00> : vector<16xf32>
    %26 = vector.multi_reduction <add>, %25, %cst_13 [1] : vector<16x32xf32> to vector<16xf32>
    %27 = vector.shape_cast %26 : vector<16xf32> to vector<16x1xf32>
    %cst_14 = arith.constant 3.200000e+01 : f32
    %28 = vector.broadcast %cst_14 : f32 to vector<16x1xf32>
    %29 = arith.divf %27, %28 : vector<16x1xf32>
    %30 = vector.broadcast %22 : vector<16x1xf32> to vector<16x32xf32>
    %31 = arith.subf %0, %30 : vector<16x32xf32>
    %cst_15 = arith.constant 9.99999974E-6 : f32
    %32 = vector.broadcast %cst_15 : f32 to vector<16x1xf32>
    %33 = arith.addf %29, %32 : vector<16x1xf32>
    %34 = math.rsqrt %33 : vector<16x1xf32>
    %35 = vector.broadcast %34 : vector<16x1xf32> to vector<16x32xf32>
    %36 = arith.mulf %31, %35 : vector<16x32xf32>
    %37 = vector.broadcast %11 : vector<1x32xf32> to vector<16x32xf32>
    %38 = arith.mulf %36, %37 : vector<16x32xf32>
    %39 = vector.broadcast %12 : vector<1x32xf32> to vector<16x32xf32>
    %40 = arith.addf %38, %39 : vector<16x32xf32>
    %41 = arith.truncf %40 : vector<16x32xf32> to vector<16x32xbf16>
    %cst_16 = arith.constant dense<0.000000e+00> : vector<16x96xf32>
    %42 = tpu.matmul %41, %6, %cst_16 {dimension_numbers = #tpu.dot_dimension_numbers<[1], [0], [0], [1], [0, 0, 1, 1], [], []>} : vector<16x32xbf16>, vector<32x96xbf16>, vector<16x96xf32> -> vector<16x96xf32>
    %43 = vector.broadcast %15 : vector<1x96xf32> to vector<16x96xf32>
    %44 = arith.addf %42, %43 : vector<16x96xf32>
    %45 = vector.extract_strided_slice %44 {offsets = [0, 0], sizes = [16, 16], strides = [1, 1]} : vector<16x96xf32> to vector<16x16xf32>
    %46 = vector.extract_strided_slice %44 {offsets = [0, 32], sizes = [16, 16], strides = [1, 1]} : vector<16x96xf32> to vector<16x16xf32>
    %47 = vector.extract_strided_slice %44 {offsets = [0, 64], sizes = [16, 16], strides = [1, 1]} : vector<16x96xf32> to vector<16x16xf32>
    %48 = arith.truncf %45 : vector<16x16xf32> to vector<16x16xbf16>
    %49 = arith.truncf %46 : vector<16x16xf32> to vector<16x16xbf16>
    %cst_17 = arith.constant dense<0.000000e+00> : vector<16x16xf32>
    %50 = tpu.matmul %48, %49, %cst_17 {dimension_numbers = #tpu.dot_dimension_numbers<[1], [1], [0], [0], [0, 0, 1, 0], [], []>} : vector<16x16xbf16>, vector<16x16xbf16>, vector<16x16xf32> -> vector<16x16xf32>
    %51 = arith.addf %50, %1 : vector<16x16xf32>
    %cst_18 = arith.constant dense<0xFF800000> : vector<16xf32>
    %52 = vector.multi_reduction <maximumf>, %51, %cst_18 [1] : vector<16x16xf32> to vector<16xf32>
    %53 = vector.shape_cast %52 : vector<16xf32> to vector<16x1xf32>
    %54 = vector.broadcast %53 : vector<16x1xf32> to vector<16x16xf32>
    %55 = arith.subf %51, %54 : vector<16x16xf32>
    %56 = math.exp %55 : vector<16x16xf32>
    %cst_19 = arith.constant dense<0.000000e+00> : vector<16xf32>
    %57 = vector.multi_reduction <add>, %56, %cst_19 [1] : vector<16x16xf32> to vector<16xf32>
    %58 = vector.shape_cast %57 : vector<16xf32> to vector<16x1xf32>
    %59 = tpu.reciprocal %58 {approx = true} : vector<16x1xf32> -> vector<16x1xf32>
    %60 = vector.broadcast %59 : vector<16x1xf32> to vector<16x16xf32>
    %61 = arith.mulf %56, %60 : vector<16x16xf32>
    %62 = arith.truncf %61 : vector<16x16xf32> to vector<16x16xbf16>
    %63 = arith.truncf %47 : vector<16x16xf32> to vector<16x16xbf16>
    %cst_20 = arith.constant dense<0.000000e+00> : vector<16x16xf32>
    %64 = tpu.matmul %62, %63, %cst_20 {dimension_numbers = #tpu.dot_dimension_numbers<[1], [0], [0], [1], [0, 0, 1, 1], [], []>} : vector<16x16xbf16>, vector<16x16xbf16>, vector<16x16xf32> -> vector<16x16xf32>
    %65 = vector.extract_strided_slice %44 {offsets = [0, 16], sizes = [16, 16], strides = [1, 1]} : vector<16x96xf32> to vector<16x16xf32>
    %66 = vector.extract_strided_slice %44 {offsets = [0, 48], sizes = [16, 16], strides = [1, 1]} : vector<16x96xf32> to vector<16x16xf32>
    %67 = vector.extract_strided_slice %44 {offsets = [0, 80], sizes = [16, 16], strides = [1, 1]} : vector<16x96xf32> to vector<16x16xf32>
    %68 = arith.truncf %65 : vector<16x16xf32> to vector<16x16xbf16>
    %69 = arith.truncf %66 : vector<16x16xf32> to vector<16x16xbf16>
    %cst_21 = arith.constant dense<0.000000e+00> : vector<16x16xf32>
    %70 = tpu.matmul %68, %69, %cst_21 {dimension_numbers = #tpu.dot_dimension_numbers<[1], [1], [0], [0], [0, 0, 1, 0], [], []>} : vector<16x16xbf16>, vector<16x16xbf16>, vector<16x16xf32> -> vector<16x16xf32>
    %71 = arith.addf %70, %1 : vector<16x16xf32>
    %cst_22 = arith.constant dense<0xFF800000> : vector<16xf32>
    %72 = vector.multi_reduction <maximumf>, %71, %cst_22 [1] : vector<16x16xf32> to vector<16xf32>
    %73 = vector.shape_cast %72 : vector<16xf32> to vector<16x1xf32>
    %74 = vector.broadcast %73 : vector<16x1xf32> to vector<16x16xf32>
    %75 = arith.subf %71, %74 : vector<16x16xf32>
    %76 = math.exp %75 : vector<16x16xf32>
    %cst_23 = arith.constant dense<0.000000e+00> : vector<16xf32>
    %77 = vector.multi_reduction <add>, %76, %cst_23 [1] : vector<16x16xf32> to vector<16xf32>
    %78 = vector.shape_cast %77 : vector<16xf32> to vector<16x1xf32>
    %79 = tpu.reciprocal %78 {approx = true} : vector<16x1xf32> -> vector<16x1xf32>
    %80 = vector.broadcast %79 : vector<16x1xf32> to vector<16x16xf32>
    %81 = arith.mulf %76, %80 : vector<16x16xf32>
    %82 = arith.truncf %81 : vector<16x16xf32> to vector<16x16xbf16>
    %83 = arith.truncf %67 : vector<16x16xf32> to vector<16x16xbf16>
    %cst_24 = arith.constant dense<0.000000e+00> : vector<16x16xf32>
    %84 = tpu.matmul %82, %83, %cst_24 {dimension_numbers = #tpu.dot_dimension_numbers<[1], [0], [0], [1], [0, 0, 1, 1], [], []>} : vector<16x16xbf16>, vector<16x16xbf16>, vector<16x16xf32> -> vector<16x16xf32>
    %85 = tpu.concatenate %64, %84 in 1 : vector<16x16xf32>, vector<16x16xf32> -> vector<16x32xf32>
    %86 = arith.truncf %85 : vector<16x32xf32> to vector<16x32xbf16>
    %cst_25 = arith.constant dense<0.000000e+00> : vector<16x32xf32>
    %87 = tpu.matmul %86, %7, %cst_25 {dimension_numbers = #tpu.dot_dimension_numbers<[1], [0], [0], [1], [0, 0, 1, 1], [], []>} : vector<16x32xbf16>, vector<32x32xbf16>, vector<16x32xf32> -> vector<16x32xf32>
    %88 = vector.broadcast %16 : vector<1x32xf32> to vector<16x32xf32>
    %89 = arith.addf %87, %88 : vector<16x32xf32>
    %90 = arith.addf %0, %89 : vector<16x32xf32>
    %cst_26 = arith.constant dense<0.000000e+00> : vector<16xf32>
    %91 = vector.multi_reduction <add>, %90, %cst_26 [1] : vector<16x32xf32> to vector<16xf32>
    %92 = vector.shape_cast %91 : vector<16xf32> to vector<16x1xf32>
    %cst_27 = arith.constant 3.200000e+01 : f32
    %93 = vector.broadcast %cst_27 : f32 to vector<16x1xf32>
    %94 = arith.divf %92, %93 : vector<16x1xf32>
    %95 = vector.broadcast %94 : vector<16x1xf32> to vector<16x32xf32>
    %96 = arith.subf %90, %95 : vector<16x32xf32>
    %97 = arith.mulf %96, %96 : vector<16x32xf32>
    %cst_28 = arith.constant dense<0.000000e+00> : vector<16xf32>
    %98 = vector.multi_reduction <add>, %97, %cst_28 [1] : vector<16x32xf32> to vector<16xf32>
    %99 = vector.shape_cast %98 : vector<16xf32> to vector<16x1xf32>
    %cst_29 = arith.constant 3.200000e+01 : f32
    %100 = vector.broadcast %cst_29 : f32 to vector<16x1xf32>
    %101 = arith.divf %99, %100 : vector<16x1xf32>
    %102 = vector.broadcast %94 : vector<16x1xf32> to vector<16x32xf32>
    %103 = arith.subf %90, %102 : vector<16x32xf32>
    %cst_30 = arith.constant 9.99999974E-6 : f32
    %104 = vector.broadcast %cst_30 : f32 to vector<16x1xf32>
    %105 = arith.addf %101, %104 : vector<16x1xf32>
    %106 = math.rsqrt %105 : vector<16x1xf32>
    %107 = vector.broadcast %106 : vector<16x1xf32> to vector<16x32xf32>
    %108 = arith.mulf %103, %107 : vector<16x32xf32>
    %109 = vector.broadcast %13 : vector<1x32xf32> to vector<16x32xf32>
    %110 = arith.mulf %108, %109 : vector<16x32xf32>
    %111 = vector.broadcast %14 : vector<1x32xf32> to vector<16x32xf32>
    %112 = arith.addf %110, %111 : vector<16x32xf32>
    %113 = arith.truncf %112 : vector<16x32xf32> to vector<16x32xbf16>
    %cst_31 = arith.constant dense<0.000000e+00> : vector<16x64xf32>
    %114 = tpu.matmul %113, %8, %cst_31 {dimension_numbers = #tpu.dot_dimension_numbers<[1], [0], [0], [1], [0, 0, 1, 1], [], []>} : vector<16x32xbf16>, vector<32x64xbf16>, vector<16x64xf32> -> vector<16x64xf32>
    %115 = vector.broadcast %17 : vector<1x64xf32> to vector<16x64xf32>
    %116 = arith.addf %114, %115 : vector<16x64xf32>
    %117 = arith.mulf %116, %116 : vector<16x64xf32>
    %118 = arith.mulf %116, %117 : vector<16x64xf32>
    %cst_32 = arith.constant 4.471500e-02 : f32
    %119 = vector.broadcast %cst_32 : f32 to vector<16x64xf32>
    %120 = arith.mulf %119, %118 : vector<16x64xf32>
    %121 = arith.addf %116, %120 : vector<16x64xf32>
    %cst_33 = arith.constant 0.797884583 : f32
    %122 = vector.broadcast %cst_33 : f32 to vector<16x64xf32>
    %123 = arith.mulf %122, %121 : vector<16x64xf32>
    %124 = math.tanh %123 : vector<16x64xf32>
    %cst_34 = arith.constant 1.000000e+00 : f32
    %125 = vector.broadcast %cst_34 : f32 to vector<16x64xf32>
    %126 = arith.addf %125, %124 : vector<16x64xf32>
    %cst_35 = arith.constant 5.000000e-01 : f32
    %127 = vector.broadcast %cst_35 : f32 to vector<16x64xf32>
    %128 = arith.mulf %127, %126 : vector<16x64xf32>
    %129 = arith.mulf %116, %128 : vector<16x64xf32>
    %130 = arith.truncf %129 : vector<16x64xf32> to vector<16x64xbf16>
    %cst_36 = arith.constant dense<0.000000e+00> : vector<16x32xf32>
    %131 = tpu.matmul %130, %10, %cst_36 {dimension_numbers = #tpu.dot_dimension_numbers<[1], [0], [0], [1], [0, 0, 1, 1], [], []>} : vector<16x64xbf16>, vector<64x32xbf16>, vector<16x32xf32> -> vector<16x32xf32>
    %132 = vector.broadcast %18 : vector<1x32xf32> to vector<16x32xf32>
    %133 = arith.addf %131, %132 : vector<16x32xf32>
    %134 = arith.addf %90, %133 : vector<16x32xf32>
    %c1 = arith.constant 1 : index
    %c0_37 = arith.constant 0 : index
    %c0_38 = arith.constant 0 : index
    %135 = vector.load %arg2[%c1, %c0_37, %c0_38] : memref<2x32x384xbf16, #tpu.memory_space<vmem>>, vector<1x32x384xbf16>
    %136 = vector.shape_cast %135 : vector<1x32x384xbf16> to vector<32x384xbf16>
    %c1_39 = arith.constant 1 : index
    %c0_40 = arith.constant 0 : index
    %c0_41 = arith.constant 0 : index
    %137 = vector.load %arg4[%c1_39, %c0_40, %c0_41] : memref<3x8x128xf32, #tpu.memory_space<vmem>>, vector<1x8x128xf32>
    %138 = vector.shape_cast %137 : vector<1x8x128xf32> to vector<8x128xf32>
    %139 = vector.extract_strided_slice %136 {offsets = [0, 0], sizes = [32, 96], strides = [1, 1]} : vector<32x384xbf16> to vector<32x96xbf16>
    %140 = vector.extract_strided_slice %136 {offsets = [0, 128], sizes = [32, 32], strides = [1, 1]} : vector<32x384xbf16> to vector<32x32xbf16>
    %141 = vector.extract_strided_slice %136 {offsets = [0, 256], sizes = [32, 64], strides = [1, 1]} : vector<32x384xbf16> to vector<32x64xbf16>
    %c1_42 = arith.constant 1 : index
    %c0_43 = arith.constant 0 : index
    %c0_44 = arith.constant 0 : index
    %142 = vector.load %arg3[%c1_42, %c0_43, %c0_44] : memref<2x64x32xbf16, #tpu.memory_space<vmem>>, vector<1x64x32xbf16>
    %143 = vector.shape_cast %142 : vector<1x64x32xbf16> to vector<64x32xbf16>
    %144 = vector.extract_strided_slice %138 {offsets = [0, 0], sizes = [1, 32], strides = [1, 1]} : vector<8x128xf32> to vector<1x32xf32>
    %145 = vector.extract_strided_slice %138 {offsets = [1, 0], sizes = [1, 32], strides = [1, 1]} : vector<8x128xf32> to vector<1x32xf32>
    %146 = vector.extract_strided_slice %138 {offsets = [2, 0], sizes = [1, 32], strides = [1, 1]} : vector<8x128xf32> to vector<1x32xf32>
    %147 = vector.extract_strided_slice %138 {offsets = [3, 0], sizes = [1, 32], strides = [1, 1]} : vector<8x128xf32> to vector<1x32xf32>
    %148 = vector.extract_strided_slice %138 {offsets = [4, 0], sizes = [1, 96], strides = [1, 1]} : vector<8x128xf32> to vector<1x96xf32>
    %149 = vector.extract_strided_slice %138 {offsets = [5, 0], sizes = [1, 32], strides = [1, 1]} : vector<8x128xf32> to vector<1x32xf32>
    %150 = vector.extract_strided_slice %138 {offsets = [6, 0], sizes = [1, 64], strides = [1, 1]} : vector<8x128xf32> to vector<1x64xf32>
    %151 = vector.extract_strided_slice %138 {offsets = [7, 0], sizes = [1, 32], strides = [1, 1]} : vector<8x128xf32> to vector<1x32xf32>
    %cst_45 = arith.constant dense<0.000000e+00> : vector<16xf32>
    %152 = vector.multi_reduction <add>, %134, %cst_45 [1] : vector<16x32xf32> to vector<16xf32>
    %153 = vector.shape_cast %152 : vector<16xf32> to vector<16x1xf32>
    %cst_46 = arith.constant 3.200000e+01 : f32
    %154 = vector.broadcast %cst_46 : f32 to vector<16x1xf32>
    %155 = arith.divf %153, %154 : vector<16x1xf32>
    %156 = vector.broadcast %155 : vector<16x1xf32> to vector<16x32xf32>
    %157 = arith.subf %134, %156 : vector<16x32xf32>
    %158 = arith.mulf %157, %157 : vector<16x32xf32>
    %cst_47 = arith.constant dense<0.000000e+00> : vector<16xf32>
    %159 = vector.multi_reduction <add>, %158, %cst_47 [1] : vector<16x32xf32> to vector<16xf32>
    %160 = vector.shape_cast %159 : vector<16xf32> to vector<16x1xf32>
    %cst_48 = arith.constant 3.200000e+01 : f32
    %161 = vector.broadcast %cst_48 : f32 to vector<16x1xf32>
    %162 = arith.divf %160, %161 : vector<16x1xf32>
    %163 = vector.broadcast %155 : vector<16x1xf32> to vector<16x32xf32>
    %164 = arith.subf %134, %163 : vector<16x32xf32>
    %cst_49 = arith.constant 9.99999974E-6 : f32
    %165 = vector.broadcast %cst_49 : f32 to vector<16x1xf32>
    %166 = arith.addf %162, %165 : vector<16x1xf32>
    %167 = math.rsqrt %166 : vector<16x1xf32>
    %168 = vector.broadcast %167 : vector<16x1xf32> to vector<16x32xf32>
    %169 = arith.mulf %164, %168 : vector<16x32xf32>
    %170 = vector.broadcast %144 : vector<1x32xf32> to vector<16x32xf32>
    %171 = arith.mulf %169, %170 : vector<16x32xf32>
    %172 = vector.broadcast %145 : vector<1x32xf32> to vector<16x32xf32>
    %173 = arith.addf %171, %172 : vector<16x32xf32>
    %174 = arith.truncf %173 : vector<16x32xf32> to vector<16x32xbf16>
    %cst_50 = arith.constant dense<0.000000e+00> : vector<16x96xf32>
    %175 = tpu.matmul %174, %139, %cst_50 {dimension_numbers = #tpu.dot_dimension_numbers<[1], [0], [0], [1], [0, 0, 1, 1], [], []>} : vector<16x32xbf16>, vector<32x96xbf16>, vector<16x96xf32> -> vector<16x96xf32>
    %176 = vector.broadcast %148 : vector<1x96xf32> to vector<16x96xf32>
    %177 = arith.addf %175, %176 : vector<16x96xf32>
    %178 = vector.extract_strided_slice %177 {offsets = [0, 0], sizes = [16, 16], strides = [1, 1]} : vector<16x96xf32> to vector<16x16xf32>
    %179 = vector.extract_strided_slice %177 {offsets = [0, 32], sizes = [16, 16], strides = [1, 1]} : vector<16x96xf32> to vector<16x16xf32>
    %180 = vector.extract_strided_slice %177 {offsets = [0, 64], sizes = [16, 16], strides = [1, 1]} : vector<16x96xf32> to vector<16x16xf32>
    %181 = arith.truncf %178 : vector<16x16xf32> to vector<16x16xbf16>
    %182 = arith.truncf %179 : vector<16x16xf32> to vector<16x16xbf16>
    %cst_51 = arith.constant dense<0.000000e+00> : vector<16x16xf32>
    %183 = tpu.matmul %181, %182, %cst_51 {dimension_numbers = #tpu.dot_dimension_numbers<[1], [1], [0], [0], [0, 0, 1, 0], [], []>} : vector<16x16xbf16>, vector<16x16xbf16>, vector<16x16xf32> -> vector<16x16xf32>
    %184 = arith.addf %183, %1 : vector<16x16xf32>
    %cst_52 = arith.constant dense<0xFF800000> : vector<16xf32>
    %185 = vector.multi_reduction <maximumf>, %184, %cst_52 [1] : vector<16x16xf32> to vector<16xf32>
    %186 = vector.shape_cast %185 : vector<16xf32> to vector<16x1xf32>
    %187 = vector.broadcast %186 : vector<16x1xf32> to vector<16x16xf32>
    %188 = arith.subf %184, %187 : vector<16x16xf32>
    %189 = math.exp %188 : vector<16x16xf32>
    %cst_53 = arith.constant dense<0.000000e+00> : vector<16xf32>
    %190 = vector.multi_reduction <add>, %189, %cst_53 [1] : vector<16x16xf32> to vector<16xf32>
    %191 = vector.shape_cast %190 : vector<16xf32> to vector<16x1xf32>
    %192 = tpu.reciprocal %191 {approx = true} : vector<16x1xf32> -> vector<16x1xf32>
    %193 = vector.broadcast %192 : vector<16x1xf32> to vector<16x16xf32>
    %194 = arith.mulf %189, %193 : vector<16x16xf32>
    %195 = arith.truncf %194 : vector<16x16xf32> to vector<16x16xbf16>
    %196 = arith.truncf %180 : vector<16x16xf32> to vector<16x16xbf16>
    %cst_54 = arith.constant dense<0.000000e+00> : vector<16x16xf32>
    %197 = tpu.matmul %195, %196, %cst_54 {dimension_numbers = #tpu.dot_dimension_numbers<[1], [0], [0], [1], [0, 0, 1, 1], [], []>} : vector<16x16xbf16>, vector<16x16xbf16>, vector<16x16xf32> -> vector<16x16xf32>
    %198 = vector.extract_strided_slice %177 {offsets = [0, 16], sizes = [16, 16], strides = [1, 1]} : vector<16x96xf32> to vector<16x16xf32>
    %199 = vector.extract_strided_slice %177 {offsets = [0, 48], sizes = [16, 16], strides = [1, 1]} : vector<16x96xf32> to vector<16x16xf32>
    %200 = vector.extract_strided_slice %177 {offsets = [0, 80], sizes = [16, 16], strides = [1, 1]} : vector<16x96xf32> to vector<16x16xf32>
    %201 = arith.truncf %198 : vector<16x16xf32> to vector<16x16xbf16>
    %202 = arith.truncf %199 : vector<16x16xf32> to vector<16x16xbf16>
    %cst_55 = arith.constant dense<0.000000e+00> : vector<16x16xf32>
    %203 = tpu.matmul %201, %202, %cst_55 {dimension_numbers = #tpu.dot_dimension_numbers<[1], [1], [0], [0], [0, 0, 1, 0], [], []>} : vector<16x16xbf16>, vector<16x16xbf16>, vector<16x16xf32> -> vector<16x16xf32>
    %204 = arith.addf %203, %1 : vector<16x16xf32>
    %cst_56 = arith.constant dense<0xFF800000> : vector<16xf32>
    %205 = vector.multi_reduction <maximumf>, %204, %cst_56 [1] : vector<16x16xf32> to vector<16xf32>
    %206 = vector.shape_cast %205 : vector<16xf32> to vector<16x1xf32>
    %207 = vector.broadcast %206 : vector<16x1xf32> to vector<16x16xf32>
    %208 = arith.subf %204, %207 : vector<16x16xf32>
    %209 = math.exp %208 : vector<16x16xf32>
    %cst_57 = arith.constant dense<0.000000e+00> : vector<16xf32>
    %210 = vector.multi_reduction <add>, %209, %cst_57 [1] : vector<16x16xf32> to vector<16xf32>
    %211 = vector.shape_cast %210 : vector<16xf32> to vector<16x1xf32>
    %212 = tpu.reciprocal %211 {approx = true} : vector<16x1xf32> -> vector<16x1xf32>
    %213 = vector.broadcast %212 : vector<16x1xf32> to vector<16x16xf32>
    %214 = arith.mulf %209, %213 : vector<16x16xf32>
    %215 = arith.truncf %214 : vector<16x16xf32> to vector<16x16xbf16>
    %216 = arith.truncf %200 : vector<16x16xf32> to vector<16x16xbf16>
    %cst_58 = arith.constant dense<0.000000e+00> : vector<16x16xf32>
    %217 = tpu.matmul %215, %216, %cst_58 {dimension_numbers = #tpu.dot_dimension_numbers<[1], [0], [0], [1], [0, 0, 1, 1], [], []>} : vector<16x16xbf16>, vector<16x16xbf16>, vector<16x16xf32> -> vector<16x16xf32>
    %218 = tpu.concatenate %197, %217 in 1 : vector<16x16xf32>, vector<16x16xf32> -> vector<16x32xf32>
    %219 = arith.truncf %218 : vector<16x32xf32> to vector<16x32xbf16>
    %cst_59 = arith.constant dense<0.000000e+00> : vector<16x32xf32>
    %220 = tpu.matmul %219, %140, %cst_59 {dimension_numbers = #tpu.dot_dimension_numbers<[1], [0], [0], [1], [0, 0, 1, 1], [], []>} : vector<16x32xbf16>, vector<32x32xbf16>, vector<16x32xf32> -> vector<16x32xf32>
    %221 = vector.broadcast %149 : vector<1x32xf32> to vector<16x32xf32>
    %222 = arith.addf %220, %221 : vector<16x32xf32>
    %223 = arith.addf %134, %222 : vector<16x32xf32>
    %cst_60 = arith.constant dense<0.000000e+00> : vector<16xf32>
    %224 = vector.multi_reduction <add>, %223, %cst_60 [1] : vector<16x32xf32> to vector<16xf32>
    %225 = vector.shape_cast %224 : vector<16xf32> to vector<16x1xf32>
    %cst_61 = arith.constant 3.200000e+01 : f32
    %226 = vector.broadcast %cst_61 : f32 to vector<16x1xf32>
    %227 = arith.divf %225, %226 : vector<16x1xf32>
    %228 = vector.broadcast %227 : vector<16x1xf32> to vector<16x32xf32>
    %229 = arith.subf %223, %228 : vector<16x32xf32>
    %230 = arith.mulf %229, %229 : vector<16x32xf32>
    %cst_62 = arith.constant dense<0.000000e+00> : vector<16xf32>
    %231 = vector.multi_reduction <add>, %230, %cst_62 [1] : vector<16x32xf32> to vector<16xf32>
    %232 = vector.shape_cast %231 : vector<16xf32> to vector<16x1xf32>
    %cst_63 = arith.constant 3.200000e+01 : f32
    %233 = vector.broadcast %cst_63 : f32 to vector<16x1xf32>
    %234 = arith.divf %232, %233 : vector<16x1xf32>
    %235 = vector.broadcast %227 : vector<16x1xf32> to vector<16x32xf32>
    %236 = arith.subf %223, %235 : vector<16x32xf32>
    %cst_64 = arith.constant 9.99999974E-6 : f32
    %237 = vector.broadcast %cst_64 : f32 to vector<16x1xf32>
    %238 = arith.addf %234, %237 : vector<16x1xf32>
    %239 = math.rsqrt %238 : vector<16x1xf32>
    %240 = vector.broadcast %239 : vector<16x1xf32> to vector<16x32xf32>
    %241 = arith.mulf %236, %240 : vector<16x32xf32>
    %242 = vector.broadcast %146 : vector<1x32xf32> to vector<16x32xf32>
    %243 = arith.mulf %241, %242 : vector<16x32xf32>
    %244 = vector.broadcast %147 : vector<1x32xf32> to vector<16x32xf32>
    %245 = arith.addf %243, %244 : vector<16x32xf32>
    %246 = arith.truncf %245 : vector<16x32xf32> to vector<16x32xbf16>
    %cst_65 = arith.constant dense<0.000000e+00> : vector<16x64xf32>
    %247 = tpu.matmul %246, %141, %cst_65 {dimension_numbers = #tpu.dot_dimension_numbers<[1], [0], [0], [1], [0, 0, 1, 1], [], []>} : vector<16x32xbf16>, vector<32x64xbf16>, vector<16x64xf32> -> vector<16x64xf32>
    %248 = vector.broadcast %150 : vector<1x64xf32> to vector<16x64xf32>
    %249 = arith.addf %247, %248 : vector<16x64xf32>
    %250 = arith.mulf %249, %249 : vector<16x64xf32>
    %251 = arith.mulf %249, %250 : vector<16x64xf32>
    %cst_66 = arith.constant 4.471500e-02 : f32
    %252 = vector.broadcast %cst_66 : f32 to vector<16x64xf32>
    %253 = arith.mulf %252, %251 : vector<16x64xf32>
    %254 = arith.addf %249, %253 : vector<16x64xf32>
    %cst_67 = arith.constant 0.797884583 : f32
    %255 = vector.broadcast %cst_67 : f32 to vector<16x64xf32>
    %256 = arith.mulf %255, %254 : vector<16x64xf32>
    %257 = math.tanh %256 : vector<16x64xf32>
    %cst_68 = arith.constant 1.000000e+00 : f32
    %258 = vector.broadcast %cst_68 : f32 to vector<16x64xf32>
    %259 = arith.addf %258, %257 : vector<16x64xf32>
    %cst_69 = arith.constant 5.000000e-01 : f32
    %260 = vector.broadcast %cst_69 : f32 to vector<16x64xf32>
    %261 = arith.mulf %260, %259 : vector<16x64xf32>
    %262 = arith.mulf %249, %261 : vector<16x64xf32>
    %263 = arith.truncf %262 : vector<16x64xf32> to vector<16x64xbf16>
    %cst_70 = arith.constant dense<0.000000e+00> : vector<16x32xf32>
    %264 = tpu.matmul %263, %143, %cst_70 {dimension_numbers = #tpu.dot_dimension_numbers<[1], [0], [0], [1], [0, 0, 1, 1], [], []>} : vector<16x64xbf16>, vector<64x32xbf16>, vector<16x32xf32> -> vector<16x32xf32>
    %265 = vector.broadcast %151 : vector<1x32xf32> to vector<16x32xf32>
    %266 = arith.addf %264, %265 : vector<16x32xf32>
    %267 = arith.addf %223, %266 : vector<16x32xf32>
    %c2 = arith.constant 2 : index
    %c0_71 = arith.constant 0 : index
    %c0_72 = arith.constant 0 : index
    %268 = vector.load %arg4[%c2, %c0_71, %c0_72] : memref<3x8x128xf32, #tpu.memory_space<vmem>>, vector<1x8x128xf32>
    %269 = vector.shape_cast %268 : vector<1x8x128xf32> to vector<8x128xf32>
    %270 = vector.extract_strided_slice %269 {offsets = [0, 0], sizes = [1, 32], strides = [1, 1]} : vector<8x128xf32> to vector<1x32xf32>
    %271 = vector.extract_strided_slice %269 {offsets = [1, 0], sizes = [1, 32], strides = [1, 1]} : vector<8x128xf32> to vector<1x32xf32>
    %272 = vector.extract_strided_slice %269 {offsets = [2, 0], sizes = [1, 128], strides = [1, 1]} : vector<8x128xf32> to vector<1x128xf32>
    %cst_73 = arith.constant dense<0.000000e+00> : vector<16xf32>
    %273 = vector.multi_reduction <add>, %267, %cst_73 [1] : vector<16x32xf32> to vector<16xf32>
    %274 = vector.shape_cast %273 : vector<16xf32> to vector<16x1xf32>
    %cst_74 = arith.constant 3.200000e+01 : f32
    %275 = vector.broadcast %cst_74 : f32 to vector<16x1xf32>
    %276 = arith.divf %274, %275 : vector<16x1xf32>
    %277 = vector.broadcast %276 : vector<16x1xf32> to vector<16x32xf32>
    %278 = arith.subf %267, %277 : vector<16x32xf32>
    %279 = arith.mulf %278, %278 : vector<16x32xf32>
    %cst_75 = arith.constant dense<0.000000e+00> : vector<16xf32>
    %280 = vector.multi_reduction <add>, %279, %cst_75 [1] : vector<16x32xf32> to vector<16xf32>
    %281 = vector.shape_cast %280 : vector<16xf32> to vector<16x1xf32>
    %cst_76 = arith.constant 3.200000e+01 : f32
    %282 = vector.broadcast %cst_76 : f32 to vector<16x1xf32>
    %283 = arith.divf %281, %282 : vector<16x1xf32>
    %284 = vector.broadcast %276 : vector<16x1xf32> to vector<16x32xf32>
    %285 = arith.subf %267, %284 : vector<16x32xf32>
    %cst_77 = arith.constant 9.99999974E-6 : f32
    %286 = vector.broadcast %cst_77 : f32 to vector<16x1xf32>
    %287 = arith.addf %283, %286 : vector<16x1xf32>
    %288 = math.rsqrt %287 : vector<16x1xf32>
    %289 = vector.broadcast %288 : vector<16x1xf32> to vector<16x32xf32>
    %290 = arith.mulf %285, %289 : vector<16x32xf32>
    %291 = vector.broadcast %270 : vector<1x32xf32> to vector<16x32xf32>
    %292 = arith.mulf %290, %291 : vector<16x32xf32>
    %293 = vector.broadcast %271 : vector<1x32xf32> to vector<16x32xf32>
    %294 = arith.addf %292, %293 : vector<16x32xf32>
    %295 = arith.truncf %294 : vector<16x32xf32> to vector<16x32xbf16>
    %c0_78 = arith.constant 0 : index
    %c0_79 = arith.constant 0 : index
    %296 = vector.load %arg5[%c0_78, %c0_79] : memref<32x128xbf16, #tpu.memory_space<vmem>>, vector<32x128xbf16>
    %cst_80 = arith.constant dense<0.000000e+00> : vector<16x128xf32>
    %297 = tpu.matmul %295, %296, %cst_80 {dimension_numbers = #tpu.dot_dimension_numbers<[1], [0], [0], [1], [0, 0, 1, 1], [], []>} : vector<16x32xbf16>, vector<32x128xbf16>, vector<16x128xf32> -> vector<16x128xf32>
    %298 = vector.broadcast %272 : vector<1x128xf32> to vector<16x128xf32>
    %299 = arith.addf %297, %298 : vector<16x128xf32>
    %c0_81 = arith.constant 0 : index
    %c0_82 = arith.constant 0 : index
    %300 = vector.load %arg6[%c0_81, %c0_82] : memref<16x128xf32, #tpu.memory_space<vmem>>, vector<16x128xf32>
    tpu.vector_store %arg6[%c0_81, %c0_82], %299 {strides = array<i32>} : memref<16x128xf32, #tpu.memory_space<vmem>>, vector<16x128xf32>,
    return
  }
}

</mosaic_0001>

<bundles_post_ra>
// kernel: tpu_custom_call.1
= control target key start
LH: loop header
LB: loop body
LE: loop exit
PB: predicated region body
PF: predicated region fallthrough
CT: control target
= control target key end

     0   :  { %11 = vsyncpa [#allocation3], 0  ;;  %s2326_s0 = inlined_call_operand.hbm [shape: f32[16,32], index: 0, kind: input, shape index: {}]   ;;  %s2327_s1 = inlined_call_operand.hbm [shape: f32[16,16], index: 1, kind: input, shape index: {}]   ;;  %s2328_s2 = inlined_call_operand.vmem [shape: bf16[2,32,384], index: 2, kind: input, shape index: {}]   ;;  %s2329_s3 = inlined_call_operand.vmem [shape: bf16[2,64,32], index: 3, kind: input, shape index: {}]   ;;  %s2330_s4 = inlined_call_operand.hbm [shape: f32[3,8,128], index: 4, kind: input, shape index: {}]   ;;  %s2331_s5 = inlined_call_operand.vmem [shape: bf16[32,128], index: 5, kind: input, shape index: {}]   ;;  %s2332_s6 = inlined_call_operand.hbm [shape: f32[16,128], index: 6, kind: output, shape index: {}]  }
   0x1   :  { %12 = vsyncpa [#allocation6], 0 }
   0x2   :  { %13 = vsyncpa [#allocation4], 0  ;;  %s1874_s21 = smov [#allocation5]   ;;  %s1875_s23 = smov [#allocation2]  }
   0x3   :  { %s31_s22 = sshll.u32 %s1874_s21, 4  ;;  %s19_s24 = sshll.u32 %s1875_s23, 4  ;;  %s32_s22 = int_to_ptr.vmem [resolvable:$true] %s31_s22  ;;  %s1923_s24 = int_to_ptr.vmem [resolvable:$true] %s19_s24 }
   0x4   :  { %s1780_s27 = scalar_lea.hbm %s2327_s1, 256 }
   0x5   :  { %p1781_p0 = scmp.ne.s32.totalorder %s2327_s1, %s1780_s27  ;;  %p1784_p1 = scmp.lt.u32.totalorder %s1780_s27, %s2327_s1 }
   0x7   :  { %p1786_p2 = pnand %p1784_p1, %p1781_p0 }
   0x9   :  { %1789 = shalt.err (!%p1786_p2)
}
   0xa   :  { %s1790_s8 = scalar_lea.vmem %s32_s22, 256  ;;  %p1795_p4 = scmp.lt.s32.totalorder %s32_s22, %s32_s22 }
   0xb   :  { %p1791_p3 = scmp.ne.s32.totalorder %s32_s22, %s1790_s8  ;;  %p1796_p5 = scmp.lt.s32.totalorder %s1790_s8, %s1790_s8 }
   0xd   :  { %p1797_p6 = por %p1796_p5, %p1795_p4 }
   0xf   :  { %p1798_p7 = pnand %p1797_p6, %p1791_p3 }
  0x11   :  { %1801 = shalt.err (!%p1798_p7)
}
  0x12   :  { %s1876_s9 = smov 128   ;;  %s1877_s10 = smov 8  }
  0x13   :  { %37 = dma.hbm_to_vmem [thread:$0]  %s2327_s1, 256, %s32_s22, [#allocation6], %s1876_s9, %s1876_s9, %s1877_s10  }
  0x14   :  { %s1802_s15 = scalar_lea.hbm %s2326_s0, 256 }
  0x15   :  { %p1803_p8 = scmp.ne.s32.totalorder %s2326_s0, %s1802_s15  ;;  %p1806_p9 = scmp.lt.u32.totalorder %s1802_s15, %s2326_s0 }
  0x17   :  { %p1808_p10 = pnand %p1806_p9, %p1803_p8 }
  0x19   :  { %1811 = shalt.err (!%p1808_p10)
}
  0x1a   :  { %s1812_s20 = scalar_lea.vmem %s1923_s24, 256  ;;  %p1817_p12 = scmp.lt.s32.totalorder %s1923_s24, %s1923_s24 }
  0x1b   :  { %p1813_p11 = scmp.ne.s32.totalorder %s1923_s24, %s1812_s20  ;;  %p1818_p13 = scmp.lt.s32.totalorder %s1812_s20, %s1812_s20 }
  0x1d   :  { %p1819_p0 = por %p1818_p13, %p1817_p12 }
  0x1f   :  { %p1820_p1 = pnand %p1819_p0, %p1813_p11 }
  0x21   :  { %1823 = shalt.err (!%p1820_p1)
}
  0x22   :  { %25 = dma.hbm_to_vmem [thread:$0]  %s2326_s0, 256, %s1923_s24, [#allocation3], %s1876_s9, %s1876_s9, %s1877_s10  }
  0x23   :  { %s1878_s22 = smov [#allocation7]   ;;  %s1824_s27 = scalar_lea.hbm %s2330_s4, 384 }
  0x24   :  { %s47_s23 = sshll.u32 %s1878_s22, 4  ;;  %p1825_p2 = scmp.ne.s32.totalorder %s2330_s4, %s1824_s27  ;;  %s48_s23 = int_to_ptr.vmem [resolvable:$true] %s47_s23 }
  0x25   :  { %p1828_p3 = scmp.lt.u32.totalorder %s1824_s27, %s2330_s4 }
  0x27   :  { %p1830_p4 = pnand %p1828_p3, %p1825_p2 }
  0x29   :  { %1833 = shalt.err (!%p1830_p4)
}
  0x2a   :  { %s1834_s8 = scalar_lea.vmem %s48_s23, 384  ;;  %p1839_p6 = scmp.lt.s32.totalorder %s48_s23, %s48_s23 }
  0x2b   :  { %p1835_p5 = scmp.ne.s32.totalorder %s48_s23, %s1834_s8  ;;  %p1840_p7 = scmp.lt.s32.totalorder %s1834_s8, %s1834_s8 }
  0x2d   :  { %p1841_p8 = por %p1840_p7, %p1839_p6 }
  0x2f   :  { %p1842_p9 = pnand %p1841_p8, %p1835_p5 }
  0x31   :  { %1845 = shalt.err (!%p1842_p9)
}
  0x32   :  { %53 = dma.hbm_to_vmem [thread:$0]  %s2330_s4, 384, %s48_s23, [#allocation6], %s1876_s9, %s1876_s9, %s1877_s10  }
  0x33   :  { %1868 = dma.done.wait [#allocation3], 256  }
  0x34   :  { %1869 = vsyncadd [#allocation3], 4294967040 }
  0x35   :  { %1870 = dma.done.wait [#allocation6], 640  }
  0x36   :  { %1871 = vsyncadd [#allocation6], 4294966656  ;;  %vm87_vm0 = vcmask 261120   ;;  %v1975_v0 = vld [vmem:[#allocation2] sm:$0xff]  ;;  %v1977_v1 = vld [vmem:[#allocation2 + $0x8] sm:$0xff]  ;;  %v1879_v15 = vmov 0.0   ;;  %v115_v21 = vlaneseq }
  0x37   :  { %v88_v2 = vsel %vm87_vm0, %v1975_v0, 0.0  ;;  %v91_v3 = vsel %vm87_vm0, %v1977_v1, 0.0  ;;  %v1694_v14 = vld [vmem:[%s2328_s2] ss:$12 sps:$4 sm:$0xff]   ;;  %1542 = vmatprep.subr.bf16.mxu0 %v1879_v15  ;;  %1550 = vmatprep.subr.bf16.mxu1 %v1879_v15  ;;  %v1697_v16 = vld [vmem:[%s2328_s2 + $0x18] ss:$12 sps:$4 sm:$0xff]  }
  0x38   :  { %89 = vadd.xlane.f32.xlu0 %v88_v2  ;;  %1543 = vmatpush3.bf16.msra.mxu0 %v1694_v14  ;;  %vm1880_vm1 = vmmov 0   ;;  %v2001_v24 = vshrl.u32 %v115_v21, 7  ;;  %v2006_v26 = vld [vmem:[#allocation7] sm:$0xff]  ;;  %s1881_s14 = smov 80   ;;  %s1882_s15 = smov 96   ;;  %vm192_vm2 = vcmask 130048  }
  0x39   :  { %1544 = vmatprep.subr.bf16.mxu0 %v1879_v15  ;;  %1546 = vmatprep.mubr.msk.bf16.mxu0 %vm1880_vm1, %v1879_v15  ;;  %s1883_s16 = smov 112   ;;  %v1696_v52 = vld [vmem:[%s2328_s2 + $0x4] ss:$12 sps:$4 sm:$0xff]   ;;  %v1699_v54 = vld [vmem:[%s2328_s2 + $0x1c] ss:$12 sps:$4 sm:$0xff]   ;;  %s1884_s1 = smov 64  }
  0x3a   :  { %1552 = vmatprep.mubr.msk.bf16.mxu1 %vm1880_vm1, %v1879_v15  ;;  %v2004_v25 = vsub.s32 0, %v2001_v24  ;;  %v2011_v30 = vsub.s32 1, %v2001_v24  ;;  %v130_v39 = vsub.s32 4, %v2001_v24  ;;  %v2049_v55 = vld [vmem:[#allocation5] sm:$0xff]  ;;  %v2051_v57 = vld [vmem:[#allocation5 + $0x8] sm:$0xff]  ;;  %s1885_s21 = smov 48  }
  0x3b   :  { %s1886_s22 = smov 16   ;;  %vm646_vm3 = vcmask 523264  }
  0x3c   :  { %92 = vadd.xlane.f32.xlu0 %v91_v3  ;;  %1545 = vmatpush3.bf16.msra.mxu0 %v1697_v16  ;;  %v118_v29 = vrot.slane %v2006_v26, %v2004_v25  ;;  %v124_v34 = vrot.slane %v2006_v26, %v2011_v30  ;;  %v131_v40 = vrot.slane %v2006_v26, %v130_v39 }
  0x3d   :  { %1556 = vmatprep.subr.bf16.mxu0 %v1879_v15 }
  0xc5   :  { %v90_v4 = vpop.xlane.xlu0 %89 }
  0xc6   :  { %v95_v5 = vmul.f32 0.03125, %v90_v4 }
  0xc8   :  { %v97_v6 = vsub.f32 %v1975_v0, %v95_v5 }
  0xc9   :  { %v93_v7 = vpop.xlane.xlu0 %92 }
  0xca   :  { %v96_v8 = vmul.f32 0.03125, %v93_v7  ;;  %v99_v9 = vmul.f32 %v97_v6, %v97_v6 }
  0xcc   :  { %v98_v10 = vsub.f32 %v1977_v1, %v96_v8  ;;  %v101_v11 = vsel %vm87_vm0, %v99_v9, 0.0 }
  0xcd   :  { %102 = vadd.xlane.f32.xlu1 %v101_v11 }
  0xce   :  { %v100_v12 = vmul.f32 %v98_v10, %v98_v10 }
  0xd0   :  { %v104_v13 = vsel %vm87_vm0, %v100_v12, 0.0 }
  0xd1   :  { %105 = vadd.xlane.f32.xlu1 %v104_v13 }
 0x15a   :  { %v103_v17 = vpop.xlane.xlu1 %102 }
 0x15b   :  { %v107_v18 = vmul.f32 0.03125, %v103_v17 }
 0x15d   :  { %v109_v19 = vadd.f32 1e-05, %v107_v18 }
 0x15e   :  { %v106_v20 = vpop.xlane.xlu1 %105 }
 0x15f   :  { %1720 = vrsqrt.f32 %v109_v19  ;;  %v108_v22 = vmul.f32 0.03125, %v106_v20 }
 0x161   :  { %v110_v23 = vadd.f32 1e-05, %v108_v22 }
 0x163   :  { %1722 = vrsqrt.f32 %v110_v23 }
 0x169   :  { %v1721_v27 = vpop.eup %1720 }
 0x16a   :  { %v113_v28 = vmul.f32 %v1721_v27, %v97_v6 }
 0x16c   :  { %v119_v33 = vmul.f32 %v118_v29, %v113_v28 }
 0x16d   :  { %v1723_v31 = vpop.eup %1722 }
 0x16e   :  { %v114_v32 = vmul.f32 %v1723_v31, %v98_v10  ;;  %v125_v36 = vadd.f32 %v124_v34, %v119_v33 }
 0x170   :  { %v120_v35 = vmul.f32 %v118_v29, %v114_v32 }
 0x172   :  { %v126_v37 = vadd.f32 %v124_v34, %v120_v35 }
 0x174   :  { %v127_v38 = vpack.c.bf16 %v126_v37, %v125_v36 }
 0x176   :  { %1547 = vmatmul.mubr.msk.bf16.vlgmr.msra.gmra.mrb[0].mxu0 %vm87_vm0, %v127_v38 }
 0x177   :  { %1558 = vmatprep.mubr.msk.bf16.mxu0 %vm1880_vm1, %v1879_v15 }
 0x249   :  { %v181_v41 = vpop.f32.mrb[0].mxu0 }
 0x24a   :  { %v1548_v42 = vpop.f32.mrb[1].mxu0  ;;  %v182_v44 = vadd.f32 %v181_v41, %v131_v40 }
 0x24b   :  { %v184_v43 = vpop.f32.mrb[2].mxu0 }
 0x24c   :  { %v185_v45 = vadd.f32 %v184_v43, %v131_v40  ;;  %v1549_v46 = vpop.f32.mrb[3].mxu0 }
 0x24e   :  { %v2022_v47 = vpack.c.bf16 %v185_v45, %v182_v44 }
 0x250   :  { %312 = vrot.lane.b32.xlu1 %v2022_v47, %s1881_s14  ;;  %190 = vrot.lane.b32.xlu0 %v2022_v47, %s1882_s15 }
 0x254   :  { %310 = vrot.lane.b32.xlu1 %v2022_v47, %s1883_s16 }
 0x2c2   :  { %v191_v48 = vpop.permute.xlu0 %190  ;;  %v313_v50 = vpop.permute.xlu1 %312 }
 0x2c3   :  { %v197_v49 = vsel %vm192_vm2, %v191_v48, 0  ;;  %v318_v51 = vsel %vm192_vm2, %v313_v50, 0 }
 0x2c4   :  { %1551 = vmatpush3.bf16.xpose.msra.mxu1 %v197_v49 }
 0x2c5   :  { %1562 = vmatprep.subr.bf16.mxu1 %v1879_v15 }
 0x2c6   :  { %v311_v53 = vpop.permute.xlu1 %310 }
 0x2cb   :  { %1553 = vmatmul.mubr.msk.bf16.vlgmr.msra.gmra.mrb[0].mxu1 %vm192_vm2, %v2022_v47 }
 0x2cc   :  { %1563 = vmatpush3.bf16.xpose.msra.mxu1 %v318_v51  ;;  %1564 = vmatprep.mubr.msk.bf16.mxu1 %vm1880_vm1, %v1879_v15 }
 0x2cd   :  { %1574 = vmatprep.subr.bf16.mxu1 %v1879_v15 }
 0x2d3   :  { %1565 = vmatmul.mubr.msk.bf16.vlgmr.msra.gmra.mrb[4].mxu1 %vm192_vm2, %v311_v53 }
 0x2d4   :  { %1575 = vmatpush3.bf16.msra.mxu1 %v1696_v52  ;;  %1578 = vmatprep.mubr.msk.bf16.mxu1 %vm1880_vm1, %v1879_v15 }
 0x2d5   :  { %1576 = vmatprep.subr.bf16.mxu1 %v1879_v15 }
 0x2d8   :  { %1577 = vmatpush3.bf16.msra.mxu1 %v1699_v54 }
 0x2d9   :  { %1590 = vmatprep.subr.bf16.mxu1 %v1879_v15 }
 0x39e   :  { %v233_v56 = vpop.f32.mrb[0].mxu1 }
 0x39f   :  { %v234_v58 = vadd.f32 %v233_v56, %v2049_v55  ;;  %v1554_v59 = vpop.f32.mrb[1].mxu1 }
 0x3a0   :  { %v236_v60 = vpop.f32.mrb[2].mxu1 }
 0x3a1   :  { %v237_v61 = vadd.f32 %v236_v60, %v2051_v57  ;;  %v1555_v62 = vpop.f32.mrb[3].mxu1  ;;  %v240_v63 = vsel %vm192_vm2, %v234_v58, -inf }
 0x3a2   :  { %241 = vmax.xlane.f32.xlu1 %v240_v63 }
 0x3a3   :  { %v243_v2 = vsel %vm192_vm2, %v237_v61, -inf }
 0x3a4   :  { %244 = vmax.xlane.f32.xlu0 %v243_v2 }
 0x3a6   :  { %v354_v3 = vpop.f32.mrb[4].mxu1 }
 0x3a7   :  { %v355_v4 = vadd.f32 %v354_v3, %v2049_v55  ;;  %v1566_v5 = vpop.f32.mrb[5].mxu1 }
 0x3a8   :  { %v357_v6 = vpop.f32.mrb[6].mxu1 }
 0x3a9   :  { %v358_v7 = vadd.f32 %v357_v6, %v2051_v57  ;;  %v1567_v8 = vpop.f32.mrb[7].mxu1  ;;  %v361_v9 = vsel %vm192_vm2, %v355_v4, -inf }
 0x3aa   :  { %362 = vmax.xlane.f32.xlu0 %v361_v9  ;;  %v444_v8 = vsub.s32 5, %v2001_v24 }
 0x3ab   :  { %v364_v10 = vsel %vm192_vm2, %v358_v7, -inf }
 0x3ac   :  { %v445_v9 = vrot.slane %v2006_v26, %v444_v8 }
 0x3ae   :  { %365 = vmax.xlane.f32.xlu0 %v364_v10 }
 0x42f   :  { %v242_v11 = vpop.xlane.xlu1 %241 }
 0x430   :  { %v246_v12 = vsub.f32 %v234_v58, %v242_v11 }
 0x431   :  { %v245_v13 = vpop.xlane.xlu0 %244 }
 0x432   :  { %v248_v14 = vmul.f32 1.442695, %v246_v12  ;;  %v247_v16 = vsub.f32 %v237_v61, %v245_v13 }
 0x434   :  { %1724 = vpow2.f32 %v248_v14  ;;  %v250_v17 = vmul.f32 1.442695, %v247_v16 }
 0x436   :  { %1726 = vpow2.f32 %v250_v17 }
 0x437   :  { %v363_v18 = vpop.xlane.xlu0 %362 }
 0x438   :  { %v367_v19 = vsub.f32 %v355_v4, %v363_v18 }
 0x43a   :  { %v369_v20 = vmul.f32 1.442695, %v367_v19 }
 0x43b   :  { %v366_v21 = vpop.xlane.xlu0 %365 }
 0x43c   :  { %1728 = vpow2.f32 %v369_v20  ;;  %v368_v22 = vsub.f32 %v358_v7, %v366_v21 }
 0x43e   :  { %v1725_v23 = vpop.eup %1724  ;;  %v371_v27 = vmul.f32 1.442695, %v368_v22 }
 0x43f   :  { %v252_v28 = vsel %vm192_vm2, %v1725_v23, 0.0 }
 0x440   :  { %v1727_v29 = vpop.eup %1726  ;;  %1730 = vpow2.f32 %v371_v27  ;;  %253 = vadd.xlane.f32.xlu1 %v252_v28 }
 0x441   :  { %v255_v31 = vsel %vm192_vm2, %v1727_v29, 0.0 }
 0x442   :  { %256 = vadd.xlane.f32.xlu0 %v255_v31 }
 0x446   :  { %v1729_v32 = vpop.eup %1728 }
 0x447   :  { %v373_v33 = vsel %vm192_vm2, %v1729_v32, 0.0 }
 0x448   :  { %374 = vadd.xlane.f32.xlu1 %v373_v33  ;;  %v1700_v33 = vld [vmem:[%s2328_s2 + $0x8] ss:$12 sps:$4 sm:$0xff]  }
 0x44a   :  { %v1731_v34 = vpop.eup %1730 }
 0x44b   :  { %v376_v35 = vsel %vm192_vm2, %v1731_v34, 0.0 }
 0x44c   :  { %377 = vadd.xlane.f32.xlu0 %v376_v35 }
 0x459   :  { %263 = vrot.lane.b32.xlu1 %v2022_v47, %s1884_s1 }
 0x462   :  { %384 = vrot.lane.b32.xlu0 %v2022_v47, %s1885_s21 }
 0x4cd   :  { %v254_v36 = vpop.xlane.xlu1 %253 }
 0x4ce   :  { %1732 = vrcp.f32 %v254_v36 }
 0x4cf   :  { %v257_v37 = vpop.xlane.xlu0 %256 }
 0x4d0   :  { %1734 = vrcp.f32 %v257_v37 }
 0x4d5   :  { %v375_v38 = vpop.xlane.xlu1 %374 }
 0x4d6   :  { %1736 = vrcp.f32 %v375_v38 }
 0x4d8   :  { %v1733_v40 = vpop.eup %1732 }
 0x4d9   :  { %v264_v41 = vpop.permute.xlu1 %263  ;;  %v378_v42 = vpop.xlane.xlu0 %377  ;;  %v260_v44 = vmul.f32 %v1733_v40, %v1725_v23 }
 0x4da   :  { %v1735_v43 = vpop.eup %1734  ;;  %1738 = vrcp.f32 %v378_v42  ;;  %1557 = vmatpush3.bf16.msra.mxu0 %v264_v41  ;;  %v2110_v42 = vsub.s32 2, %v2001_v24 }
 0x4db   :  { %v261_v45 = vmul.f32 %v1735_v43, %v1727_v29  ;;  %1568 = vmatprep.subr.bf16.mxu0 %v1879_v15 }
 0x4dc   :  { %v529_v43 = vrot.slane %v2006_v26, %v2110_v42 }
 0x4dd   :  { %v385_v46 = vpop.permute.xlu0 %384  ;;  %v262_v48 = vpack.c.bf16 %v261_v45, %v260_v44  ;;  %v534_v44 = vsub.s32 3, %v2001_v24 }
 0x4df   :  { %1559 = vmatmul.mubr.msk.bf16.vlgmr.msra.gmra.mrb[4].mxu0 %vm192_vm2, %v262_v48 }
 0x4e0   :  { %1569 = vmatpush3.bf16.msra.mxu0 %v385_v46  ;;  %1570 = vmatprep.mubr.msk.bf16.mxu0 %vm1880_vm1, %v1879_v15  ;;  %v1737_v47 = vpop.eup %1736 }
 0x4e1   :  { %1582 = vmatprep.subr.bf16.mxu0 %v1879_v15  ;;  %v381_v50 = vmul.f32 %v1737_v47, %v1729_v32 }
 0x4e4   :  { %v1739_v49 = vpop.eup %1738 }
 0x4e5   :  { %v382_v51 = vmul.f32 %v1739_v49, %v1731_v34  ;;  %v1701_v34 = vld [vmem:[%s2328_s2 + $0x20] ss:$12 sps:$4 sm:$0xff]  }
 0x4e7   :  { %v383_v52 = vpack.c.bf16 %v382_v51, %v381_v50  ;;  %v535_v50 = vrot.slane %v2006_v26, %v534_v44 }
 0x4e9   :  { %1571 = vmatmul.mubr.msk.bf16.vlgmr.msra.gmra.mrb[8].mxu0 %vm192_vm2, %v383_v52 }
 0x4ea   :  { %1586 = vmatprep.mubr.msk.bf16.mxu0 %vm1880_vm1, %v1879_v15  ;;  %1583 = vmatpush3.bf16.msra.mxu0 %v1700_v33 }
 0x4eb   :  { %1584 = vmatprep.subr.bf16.mxu0 %v1879_v15 }
 0x4ee   :  { %1585 = vmatpush3.bf16.msra.mxu0 %v1701_v34 }
 0x4ef   :  { %1602 = vmatprep.subr.bf16.mxu0 %v1879_v15 }
 0x5b2   :  { %v303_v53 = vpop.f32.mrb[4].mxu0 }
 0x5b3   :  { %v1560_v54 = vpop.f32.mrb[5].mxu0 }
 0x5b4   :  { %v306_v56 = vpop.f32.mrb[6].mxu0 }
 0x5b5   :  { %v1561_v58 = vpop.f32.mrb[7].mxu0 }
 0x5b6   :  { %v1703_v58 = vld [vmem:[%s2329_s3 + $0x8] sm:$0xff]  }
 0x5bc   :  { %v424_v59 = vpop.f32.mrb[8].mxu0 }
 0x5bd   :  { %v1572_v60 = vpop.f32.mrb[9].mxu0 }
 0x5be   :  { %v427_v61 = vpop.f32.mrb[10].mxu0  ;;  %v1705_v60 = vld [vmem:[%s2329_s3 + $0x18] sm:$0xff]  }
 0x5bf   :  { %v1684_v62 = vpack.i.bf16 %v427_v61, %v424_v59  ;;  %v1573_v63 = vpop.f32.mrb[11].mxu0  ;;  %v1704_v59 = vld [vmem:[%s2329_s3 + $0x10] sm:$0xff]   ;;  %v541_v61 = vsub.s32 6, %v2001_v24 }
 0x5c1   :  { %1685 = vrot.lane.b32.xlu1 %v1684_v62, %s1886_s22  ;;  %v542_v62 = vrot.slane %v2006_v26, %v541_v61 }
 0x633   :  { %v1686_v2 = vpop.permute.xlu1 %1685 }
 0x634   :  { %v1688_v3 = vunpack.i.h.bf16 %v1686_v2  ;;  %v1687_v4 = vunpack.i.l.bf16 %v1686_v2 }
 0x636   :  { %v440_v5 = vsel %vm192_vm2, %v306_v56, %v1688_v3  ;;  %v439_v6 = vsel %vm192_vm2, %v303_v53, %v1687_v4  ;;  %v1702_v56 = vld [vmem:[%s2329_s3] sm:$0xff]  }
 0x637   :  { %v441_v7 = vpack.c.bf16 %v440_v5, %v439_v6 }
 0x639   :  { %1579 = vmatmul.mubr.msk.bf16.vlgmr.msra.gmra.mrb[8].mxu1 %vm87_vm0, %v441_v7 }
 0x63a   :  { %1598 = vmatprep.mubr.msk.bf16.mxu1 %vm1880_vm1, %v1879_v15  ;;  %1591 = vmatpush3.bf16.msra.mxu1 %v1702_v56  ;;  %v1708_v56 = vld [vmem:[%s2328_s2 + $0x48] ss:$12 sps:$4 sm:$0xff]  }
 0x63b   :  { %1592 = vmatprep.subr.bf16.mxu1 %v1879_v15 }
 0x63e   :  { %1593 = vmatpush3.bf16.msra.mxu1 %v1703_v58 }
 0x63f   :  { %1594 = vmatprep.subr.bf16.mxu1 %v1879_v15 }
 0x642   :  { %1595 = vmatpush3.bf16.msra.mxu1 %v1704_v59 }
 0x643   :  { %1596 = vmatprep.subr.bf16.mxu1 %v1879_v15 }
 0x646   :  { %1597 = vmatpush3.bf16.msra.mxu1 %v1705_v60 }
 0x647   :  { %1616 = vmatprep.subr.bf16.mxu1 %v1879_v15 }
 0x70c   :  { %v491_v10 = vpop.f32.mrb[8].mxu1 }
 0x70d   :  { %v492_v11 = vadd.f32 %v491_v10, %v445_v9  ;;  %v1580_v12 = vpop.f32.mrb[9].mxu1 }
 0x70e   :  { %v494_v13 = vpop.f32.mrb[10].mxu1 }
 0x70f   :  { %v2088_v14 = vadd.f32 %v492_v11, %v1975_v0  ;;  %v495_v16 = vadd.f32 %v494_v13, %v445_v9  ;;  %v1581_v17 = vpop.f32.mrb[11].mxu1 }
 0x711   :  { %v2091_v18 = vadd.f32 %v495_v16, %v1977_v1  ;;  %v500_v19 = vsel %vm87_vm0, %v2088_v14, 0.0 }
 0x712   :  { %501 = vadd.xlane.f32.xlu1 %v500_v19 }
 0x713   :  { %v503_v20 = vsel %vm87_vm0, %v2091_v18, 0.0 }
 0x714   :  { %504 = vadd.xlane.f32.xlu0 %v503_v20 }
 0x79f   :  { %v502_v21 = vpop.xlane.xlu1 %501 }
 0x7a0   :  { %v506_v22 = vmul.f32 0.03125, %v502_v21 }
 0x7a1   :  { %v505_v23 = vpop.xlane.xlu0 %504 }
 0x7a2   :  { %v508_v27 = vsub.f32 %v2088_v14, %v506_v22  ;;  %v507_v0 = vmul.f32 0.03125, %v505_v23 }
 0x7a4   :  { %v509_v28 = vsub.f32 %v2091_v18, %v507_v0  ;;  %v510_v29 = vmul.f32 %v508_v27, %v508_v27 }
 0x7a6   :  { %v512_v1 = vsel %vm87_vm0, %v510_v29, 0.0  ;;  %v511_v31 = vmul.f32 %v509_v28, %v509_v28 }
 0x7a7   :  { %513 = vadd.xlane.f32.xlu0 %v512_v1 }
 0x7a8   :  { %v515_v32 = vsel %vm87_vm0, %v511_v31, 0.0 }
 0x7a9   :  { %516 = vadd.xlane.f32.xlu1 %v515_v32  ;;  %v620_v32 = vsub.s32 7, %v2001_v24 }
 0x7ab   :  { %v621_v33 = vrot.slane %v2006_v26, %v620_v32 }
 0x834   :  { %v514_v35 = vpop.xlane.xlu0 %513 }
 0x835   :  { %v518_v36 = vmul.f32 0.03125, %v514_v35 }
 0x836   :  { %v517_v37 = vpop.xlane.xlu1 %516 }
 0x837   :  { %v520_v38 = vadd.f32 1e-05, %v518_v36  ;;  %v519_v40 = vmul.f32 0.03125, %v517_v37 }
 0x839   :  { %1740 = vrsqrt.f32 %v520_v38  ;;  %v521_v41 = vadd.f32 1e-05, %v519_v40 }
 0x83b   :  { %1742 = vrsqrt.f32 %v521_v41 }
 0x843   :  { %v1741_v45 = vpop.eup %1740 }
 0x844   :  { %v524_v46 = vmul.f32 %v1741_v45, %v508_v27 }
 0x845   :  { %v1743_v48 = vpop.eup %1742 }
 0x846   :  { %v530_v47 = vmul.f32 %v529_v43, %v524_v46  ;;  %v525_v49 = vmul.f32 %v1743_v48, %v509_v28 }
 0x848   :  { %v531_v51 = vmul.f32 %v529_v43, %v525_v49  ;;  %v536_v52 = vadd.f32 %v535_v50, %v530_v47 }
 0x84a   :  { %v537_v53 = vadd.f32 %v535_v50, %v531_v51 }
 0x84c   :  { %v538_v54 = vpack.c.bf16 %v537_v53, %v536_v52 }
 0x84e   :  { %1587 = vmatmul.mubr.msk.bf16.vlgmr.msra.gmra.mrb[12].mxu0 %vm87_vm0, %v538_v54  ;;  %v1706_v54 = vld [vmem:[%s2328_s2 + $0x30] ss:$12 sps:$4 sm:$0xff]  }
 0x84f   :  { %1606 = vmatprep.mubr.msk.bf16.mxu0 %vm1880_vm1, %v1879_v15  ;;  %1603 = vmatpush3.bf16.msra.mxu0 %v1706_v54 }
 0x850   :  { %1604 = vmatprep.subr.bf16.mxu0 %v1879_v15 }
 0x853   :  { %1605 = vmatpush3.bf16.msra.mxu0 %v1708_v56 }
 0x854   :  { %1610 = vmatprep.subr.bf16.mxu0 %v1879_v15 }
 0x921   :  { %v592_v63 = vpop.f32.mrb[12].mxu0 }
 0x922   :  { %v593_v2 = vadd.f32 %v592_v63, %v542_v62  ;;  %v1588_v3 = vpop.f32.mrb[13].mxu0 }
 0x923   :  { %v595_v4 = vpop.f32.mrb[14].mxu0  ;;  %v2170_v3 = vld [vmem:[#allocation7 + $0x8] sm:$0xff] }
 0x924   :  { %v599_v5 = vmul.f32 %v593_v2, %v593_v2  ;;  %v596_v6 = vadd.f32 %v595_v4, %v542_v62  ;;  %v1589_v7 = vpop.f32.mrb[15].mxu0  ;;  %v742_v4 = vrot.slane %v2170_v3, %v2004_v25 }
 0x926   :  { %v601_v9 = vmul.f32 %v599_v5, %v593_v2  ;;  %v600_v10 = vmul.f32 %v596_v6, %v596_v6 }
 0x928   :  { %v603_v11 = vmul.f32 0.044715, %v601_v9  ;;  %v602_v12 = vmul.f32 %v600_v10, %v596_v6 }
 0x92a   :  { %v605_v13 = vadd.f32 %v603_v11, %v593_v2  ;;  %v604_v16 = vmul.f32 0.044715, %v602_v12  ;;  %v748_v11 = vrot.slane %v2170_v3, %v2011_v30 }
 0x92c   :  { %v607_v17 = vmul.f32 0.7978846, %v605_v13  ;;  %v606_v19 = vadd.f32 %v604_v16, %v596_v6 }
 0x92e   :  { %1744 = vtanh.f32 %v607_v17  ;;  %v608_v20 = vmul.f32 0.7978846, %v606_v19  ;;  %v755_v19 = vrot.slane %v2170_v3, %v130_v39 }
 0x930   :  { %1746 = vtanh.f32 %v608_v20 }
 0x938   :  { %v1745_v21 = vpop.eup %1744 }
 0x939   :  { %v611_v22 = vadd.f32 1.0, %v1745_v21 }
 0x93a   :  { %v1747_v23 = vpop.eup %1746 }
 0x93b   :  { %v613_v27 = vmul.f32 0.5, %v611_v22  ;;  %v612_v0 = vadd.f32 1.0, %v1747_v23 }
 0x93d   :  { %v614_v28 = vmul.f32 0.5, %v612_v0  ;;  %v615_v29 = vmul.f32 %v613_v27, %v593_v2 }
 0x93f   :  { %v616_v1 = vmul.f32 %v614_v28, %v596_v6 }
 0x941   :  { %v617_v31 = vpack.c.bf16 %v616_v1, %v615_v29 }
 0x943   :  { %1599 = vmatmul.mubr.msk.bf16.vlgmr.msra.gmra.mrb[12].mxu1 %vm646_vm3, %v617_v31 }
 0x944   :  { %1618 = vmatprep.mubr.msk.bf16.mxu1 %vm1880_vm1, %v1879_v15 }
 0xa16   :  { %v684_v34 = vpop.f32.mrb[12].mxu1 }
 0xa17   :  { %v685_v35 = vadd.f32 %v684_v34, %v621_v33  ;;  %v1600_v36 = vpop.f32.mrb[13].mxu1 }
 0xa18   :  { %v687_v37 = vpop.f32.mrb[14].mxu1 }
 0xa19   :  { %v2149_v38 = vadd.f32 %v685_v35, %v2088_v14  ;;  %v688_v40 = vadd.f32 %v687_v37, %v621_v33  ;;  %v1601_v41 = vpop.f32.mrb[15].mxu1 }
 0xa1b   :  { %v2152_v43 = vadd.f32 %v688_v40, %v2091_v18  ;;  %v713_v45 = vsel %vm87_vm0, %v2149_v38, 0.0 }
 0xa1c   :  { %714 = vadd.xlane.f32.xlu0 %v713_v45 }
 0xa1d   :  { %v716_v46 = vsel %vm87_vm0, %v2152_v43, 0.0 }
 0xa1e   :  { %717 = vadd.xlane.f32.xlu1 %v716_v46 }
 0xaa9   :  { %v715_v26 = vpop.xlane.xlu0 %714 }
 0xaaa   :  { %v719_v48 = vmul.f32 0.03125, %v715_v26 }
 0xaab   :  { %v718_v47 = vpop.xlane.xlu1 %717 }
 0xaac   :  { %v721_v49 = vsub.f32 %v2149_v38, %v719_v48  ;;  %v720_v14 = vmul.f32 0.03125, %v718_v47 }
 0xaae   :  { %v722_v50 = vsub.f32 %v2152_v43, %v720_v14  ;;  %v723_v51 = vmul.f32 %v721_v49, %v721_v49 }
 0xab0   :  { %v725_v18 = vsel %vm87_vm0, %v723_v51, 0.0  ;;  %v724_v52 = vmul.f32 %v722_v50, %v722_v50 }
 0xab1   :  { %726 = vadd.xlane.f32.xlu0 %v725_v18 }
 0xab2   :  { %v728_v53 = vsel %vm87_vm0, %v724_v52, 0.0 }
 0xab3   :  { %729 = vadd.xlane.f32.xlu1 %v728_v53 }
 0xb3e   :  { %v727_v58 = vpop.xlane.xlu0 %726 }
 0xb3f   :  { %v731_v59 = vmul.f32 0.03125, %v727_v58 }
 0xb40   :  { %v730_v60 = vpop.xlane.xlu1 %729 }
 0xb41   :  { %v733_v62 = vadd.f32 1e-05, %v731_v59  ;;  %v732_v63 = vmul.f32 0.03125, %v730_v60 }
 0xb43   :  { %1748 = vrsqrt.f32 %v733_v62  ;;  %v734_v2 = vadd.f32 1e-05, %v732_v63 }
 0xb45   :  { %1750 = vrsqrt.f32 %v734_v2 }
 0xb4d   :  { %v1749_v5 = vpop.eup %1748 }
 0xb4e   :  { %v737_v6 = vmul.f32 %v1749_v5, %v721_v49 }
 0xb4f   :  { %v1751_v7 = vpop.eup %1750 }
 0xb50   :  { %v743_v9 = vmul.f32 %v742_v4, %v737_v6  ;;  %v738_v10 = vmul.f32 %v1751_v7, %v722_v50 }
 0xb52   :  { %v744_v12 = vmul.f32 %v742_v4, %v738_v10  ;;  %v749_v13 = vadd.f32 %v748_v11, %v743_v9 }
 0xb54   :  { %v750_v16 = vadd.f32 %v748_v11, %v744_v12 }
 0xb56   :  { %v751_v17 = vpack.c.bf16 %v750_v16, %v749_v13 }
 0xb58   :  { %1607 = vmatmul.mubr.msk.bf16.vlgmr.msra.gmra.mrb[16].mxu0 %vm87_vm0, %v751_v17 }
 0xb59   :  { %1612 = vmatprep.mubr.msk.bf16.mxu0 %vm1880_vm1, %v1879_v15 }
 0xc2b   :  { %v805_v20 = vpop.f32.mrb[16].mxu0 }
 0xc2c   :  { %v1608_v21 = vpop.f32.mrb[17].mxu0  ;;  %v806_v23 = vadd.f32 %v805_v20, %v755_v19 }
 0xc2d   :  { %v808_v22 = vpop.f32.mrb[18].mxu0 }
 0xc2e   :  { %v809_v27 = vadd.f32 %v808_v22, %v755_v19  ;;  %v1609_v0 = vpop.f32.mrb[19].mxu0 }
 0xc30   :  { %v2182_v28 = vpack.c.bf16 %v809_v27, %v806_v23 }
 0xc32   :  { %935 = vrot.lane.b32.xlu1 %v2182_v28, %s1881_s14  ;;  %814 = vrot.lane.b32.xlu0 %v2182_v28, %s1882_s15 }
 0xc36   :  { %933 = vrot.lane.b32.xlu1 %v2182_v28, %s1883_s16 }
 0xca4   :  { %v815_v29 = vpop.permute.xlu0 %814  ;;  %v936_v1 = vpop.permute.xlu1 %935 }
 0xca5   :  { %v820_v39 = vsel %vm192_vm2, %v815_v29, 0  ;;  %v941_v31 = vsel %vm192_vm2, %v936_v1, 0 }
 0xca6   :  { %1611 = vmatpush3.bf16.xpose.msra.mxu0 %v820_v39 }
 0xca7   :  { %1622 = vmatprep.subr.bf16.mxu0 %v1879_v15 }
 0xca8   :  { %v934_v33 = vpop.permute.xlu1 %933 }
 0xcad   :  { %1613 = vmatmul.mubr.msk.bf16.vlgmr.msra.gmra.mrb[20].mxu0 %vm192_vm2, %v2182_v28 }
 0xcae   :  { %1623 = vmatpush3.bf16.xpose.msra.mxu0 %v941_v31  ;;  %1624 = vmatprep.mubr.msk.bf16.mxu0 %vm1880_vm1, %v1879_v15 }
 0xcaf   :  { %1634 = vmatprep.subr.bf16.mxu0 %v1879_v15 }
 0xcb5   :  { %1625 = vmatmul.mubr.msk.bf16.vlgmr.msra.gmra.mrb[24].mxu0 %vm192_vm2, %v934_v33 }
 0xcb6   :  { %1638 = vmatprep.mubr.msk.bf16.mxu0 %vm1880_vm1, %v1879_v15 }
 0xd80   :  { %v856_v34 = vpop.f32.mrb[20].mxu0 }
 0xd81   :  { %v857_v35 = vadd.f32 %v856_v34, %v2049_v55  ;;  %v1614_v36 = vpop.f32.mrb[21].mxu0  ;;  %v1710_v34 = vld [vmem:[%s2328_s2 + $0x34] ss:$12 sps:$4 sm:$0xff]  }
 0xd82   :  { %v859_v37 = vpop.f32.mrb[22].mxu0  ;;  %1635 = vmatpush3.bf16.msra.mxu0 %v1710_v34 }
 0xd83   :  { %v860_v40 = vadd.f32 %v859_v37, %v2051_v57  ;;  %v1615_v41 = vpop.f32.mrb[23].mxu0  ;;  %v863_v45 = vsel %vm192_vm2, %v857_v35, -inf  ;;  %1636 = vmatprep.subr.bf16.mxu0 %v1879_v15 }
 0xd84   :  { %864 = vmax.xlane.f32.xlu1 %v863_v45  ;;  %v1711_v41 = vld [vmem:[%s2328_s2 + $0x4c] ss:$12 sps:$4 sm:$0xff]  }
 0xd85   :  { %v866_v46 = vsel %vm192_vm2, %v860_v40, -inf }
 0xd86   :  { %867 = vmax.xlane.f32.xlu0 %v866_v46  ;;  %1637 = vmatpush3.bf16.msra.mxu0 %v1711_v41  ;;  %v1165_v41 = vrot.slane %v2170_v3, %v541_v61 }
 0xd87   :  { %1650 = vmatprep.subr.bf16.mxu0 %v1879_v15 }
 0xd88   :  { %v977_v26 = vpop.f32.mrb[24].mxu0 }
 0xd89   :  { %v978_v48 = vadd.f32 %v977_v26, %v2049_v55  ;;  %v1626_v47 = vpop.f32.mrb[25].mxu0 }
 0xd8a   :  { %v980_v49 = vpop.f32.mrb[26].mxu0 }
 0xd8b   :  { %v981_v14 = vadd.f32 %v980_v49, %v2051_v57  ;;  %v1627_v50 = vpop.f32.mrb[27].mxu0  ;;  %v984_v51 = vsel %vm192_vm2, %v978_v48, -inf }
 0xd8c   :  { %985 = vmax.xlane.f32.xlu0 %v984_v51 }
 0xd8d   :  { %v987_v18 = vsel %vm192_vm2, %v981_v14, -inf }
 0xd90   :  { %988 = vmax.xlane.f32.xlu0 %v987_v18 }
 0xe11   :  { %v865_v52 = vpop.xlane.xlu1 %864 }
 0xe12   :  { %v869_v53 = vsub.f32 %v857_v35, %v865_v52 }
 0xe13   :  { %v868_v54 = vpop.xlane.xlu0 %867 }
 0xe14   :  { %v871_v56 = vmul.f32 1.442695, %v869_v53  ;;  %v870_v58 = vsub.f32 %v860_v40, %v868_v54  ;;  %v1068_v53 = vrot.slane %v2170_v3, %v444_v8 }
 0xe16   :  { %1752 = vpow2.f32 %v871_v56  ;;  %v873_v59 = vmul.f32 1.442695, %v870_v58 }
 0xe18   :  { %1754 = vpow2.f32 %v873_v59 }
 0xe19   :  { %v986_v55 = vpop.xlane.xlu0 %985 }
 0xe1a   :  { %v990_v60 = vsub.f32 %v978_v48, %v986_v55 }
 0xe1c   :  { %v992_v62 = vmul.f32 1.442695, %v990_v60 }
 0xe1d   :  { %v989_v63 = vpop.xlane.xlu0 %988 }
 0xe1e   :  { %1756 = vpow2.f32 %v992_v62  ;;  %v991_v57 = vsub.f32 %v981_v14, %v989_v63 }
 0xe20   :  { %v1753_v2 = vpop.eup %1752  ;;  %v994_v4 = vmul.f32 1.442695, %v991_v57 }
 0xe21   :  { %v875_v5 = vsel %vm192_vm2, %v1753_v2, 0.0 }
 0xe22   :  { %v1755_v6 = vpop.eup %1754  ;;  %1758 = vpow2.f32 %v994_v4  ;;  %876 = vadd.xlane.f32.xlu1 %v875_v5 }
 0xe23   :  { %v878_v7 = vsel %vm192_vm2, %v1755_v6, 0.0 }
 0xe24   :  { %879 = vadd.xlane.f32.xlu0 %v878_v7 }
 0xe28   :  { %v1757_v9 = vpop.eup %1756 }
 0xe29   :  { %v996_v10 = vsel %vm192_vm2, %v1757_v9, 0.0 }
 0xe2a   :  { %997 = vadd.xlane.f32.xlu1 %v996_v10 }
 0xe2c   :  { %v1759_v11 = vpop.eup %1758 }
 0xe2d   :  { %v999_v12 = vsel %vm192_vm2, %v1759_v11, 0.0 }
 0xe2e   :  { %1000 = vadd.xlane.f32.xlu0 %v999_v12  ;;  %v1712_v12 = vld [vmem:[%s2328_s2 + $0x38] ss:$12 sps:$4 sm:$0xff]  }
 0xe3b   :  { %886 = vrot.lane.b32.xlu1 %v2182_v28, %s1884_s1 }
 0xe44   :  { %1007 = vrot.lane.b32.xlu0 %v2182_v28, %s1885_s21 }
 0xeaf   :  { %v877_v13 = vpop.xlane.xlu1 %876 }
 0xeb0   :  { %1760 = vrcp.f32 %v877_v13  ;;  %v1713_v13 = vld [vmem:[%s2328_s2 + $0x50] ss:$12 sps:$4 sm:$0xff]  }
 0xeb1   :  { %v880_v16 = vpop.xlane.xlu0 %879 }
 0xeb2   :  { %1762 = vrcp.f32 %v880_v16 }
 0xeb7   :  { %v998_v17 = vpop.xlane.xlu1 %997 }
 0xeb8   :  { %1764 = vrcp.f32 %v998_v17 }
 0xeba   :  { %v1761_v19 = vpop.eup %1760 }
 0xebb   :  { %v887_v20 = vpop.permute.xlu1 %886  ;;  %v1001_v21 = vpop.xlane.xlu0 %1000  ;;  %v883_v23 = vmul.f32 %v1761_v19, %v1753_v2 }
 0xebc   :  { %v1763_v22 = vpop.eup %1762  ;;  %1766 = vrcp.f32 %v1001_v21  ;;  %1617 = vmatpush3.bf16.msra.mxu1 %v887_v20 }
 0xebd   :  { %v884_v27 = vmul.f32 %v1763_v22, %v1755_v6  ;;  %1628 = vmatprep.subr.bf16.mxu1 %v1879_v15 }
 0xebf   :  { %v1008_v0 = vpop.permute.xlu0 %1007  ;;  %v885_v29 = vpack.c.bf16 %v884_v27, %v883_v23  ;;  %v1152_v23 = vrot.slane %v2170_v3, %v2110_v42 }
 0xec1   :  { %1619 = vmatmul.mubr.msk.bf16.vlgmr.msra.gmra.mrb[16].mxu1 %vm192_vm2, %v885_v29 }
 0xec2   :  { %1629 = vmatpush3.bf16.msra.mxu1 %v1008_v0  ;;  %1630 = vmatprep.mubr.msk.bf16.mxu1 %vm1880_vm1, %v1879_v15  ;;  %v1765_v28 = vpop.eup %1764 }
 0xec3   :  { %1642 = vmatprep.subr.bf16.mxu1 %v1879_v15  ;;  %v1004_v1 = vmul.f32 %v1765_v28, %v1757_v9 }
 0xec6   :  { %v1767_v39 = vpop.eup %1766 }
 0xec7   :  { %v1005_v31 = vmul.f32 %v1767_v39, %v1759_v11 }
 0xec9   :  { %v1006_v33 = vpack.c.bf16 %v1005_v31, %v1004_v1  ;;  %v1158_v1 = vrot.slane %v2170_v3, %v534_v44  ;;  %v1715_v44 = vld [vmem:[%s2329_s3 + $0x28] sm:$0xff]  }
 0xecb   :  { %1631 = vmatmul.mubr.msk.bf16.vlgmr.msra.gmra.mrb[20].mxu1 %vm192_vm2, %v1006_v33 }
 0xecc   :  { %1646 = vmatprep.mubr.msk.bf16.mxu1 %vm1880_vm1, %v1879_v15  ;;  %1643 = vmatpush3.bf16.msra.mxu1 %v1712_v12 }
 0xecd   :  { %1644 = vmatprep.subr.bf16.mxu1 %v1879_v15 }
 0xed0   :  { %1645 = vmatpush3.bf16.msra.mxu1 %v1713_v13 }
 0xed1   :  { %1662 = vmatprep.subr.bf16.mxu1 %v1879_v15 }
 0xf94   :  { %v926_v35 = vpop.f32.mrb[16].mxu1 }
 0xf95   :  { %v1620_v36 = vpop.f32.mrb[17].mxu1 }
 0xf96   :  { %v929_v37 = vpop.f32.mrb[18].mxu1  ;;  %v1714_v36 = vld [vmem:[%s2329_s3 + $0x20] sm:$0xff]  }
 0xf97   :  { %v1621_v40 = vpop.f32.mrb[19].mxu1 }
 0xf98   :  { %v1717_v40 = vld [vmem:[%s2329_s3 + $0x38] sm:$0xff]  }
 0xf9e   :  { %v1047_v45 = vpop.f32.mrb[20].mxu1 }
 0xf9f   :  { %v1632_v46 = vpop.f32.mrb[21].mxu1 }
 0xfa0   :  { %v1050_v26 = vpop.f32.mrb[22].mxu1 }
 0xfa1   :  { %v1689_v48 = vpack.i.bf16 %v1050_v26, %v1047_v45  ;;  %v1633_v47 = vpop.f32.mrb[23].mxu1 }
 0xfa3   :  { %1690 = vrot.lane.b32.xlu1 %v1689_v48, %s1886_s22 }
0x1015   :  { %v1691_v49 = vpop.permute.xlu1 %1690 }
0x1016   :  { %v1693_v14 = vunpack.i.h.bf16 %v1691_v49  ;;  %v1692_v50 = vunpack.i.l.bf16 %v1691_v49 }
0x1018   :  { %v1063_v51 = vsel %vm192_vm2, %v929_v37, %v1693_v14  ;;  %v1062_v18 = vsel %vm192_vm2, %v926_v35, %v1692_v50  ;;  %v1716_v37 = vld [vmem:[%s2329_s3 + $0x30] sm:$0xff]  }
0x1019   :  { %v1064_v52 = vpack.c.bf16 %v1063_v51, %v1062_v18 }
0x101b   :  { %1639 = vmatmul.mubr.msk.bf16.vlgmr.msra.gmra.mrb[28].mxu0 %vm87_vm0, %v1064_v52 }
0x101c   :  { %1658 = vmatprep.mubr.msk.bf16.mxu0 %vm1880_vm1, %v1879_v15  ;;  %1651 = vmatpush3.bf16.msra.mxu0 %v1714_v36 }
0x101d   :  { %1652 = vmatprep.subr.bf16.mxu0 %v1879_v15 }
0x1020   :  { %1653 = vmatpush3.bf16.msra.mxu0 %v1715_v44 }
0x1021   :  { %1654 = vmatprep.subr.bf16.mxu0 %v1879_v15 }
0x1024   :  { %1655 = vmatpush3.bf16.msra.mxu0 %v1716_v37 }
0x1025   :  { %1656 = vmatprep.subr.bf16.mxu0 %v1879_v15 }
0x1028   :  { %1657 = vmatpush3.bf16.msra.mxu0 %v1717_v40 }
0x10ee   :  { %v1114_v54 = vpop.f32.mrb[28].mxu0 }
0x10ef   :  { %v1115_v56 = vadd.f32 %v1114_v54, %v1068_v53  ;;  %v1640_v58 = vpop.f32.mrb[29].mxu0 }
0x10f0   :  { %v1117_v59 = vpop.f32.mrb[30].mxu0 }
0x10f1   :  { %v2243_v55 = vadd.f32 %v1115_v56, %v2149_v38  ;;  %v1118_v60 = vadd.f32 %v1117_v59, %v1068_v53  ;;  %v1641_v62 = vpop.f32.mrb[31].mxu0 }
0x10f3   :  { %v2246_v63 = vadd.f32 %v1118_v60, %v2152_v43  ;;  %v1123_v57 = vsel %vm87_vm0, %v2243_v55, 0.0 }
0x10f4   :  { %1124 = vadd.xlane.f32.xlu1 %v1123_v57 }
0x10f5   :  { %v1126_v2 = vsel %vm87_vm0, %v2246_v63, 0.0 }
0x10f6   :  { %1127 = vadd.xlane.f32.xlu0 %v1126_v2 }
0x1181   :  { %v1125_v8 = vpop.xlane.xlu1 %1124 }
0x1182   :  { %v1129_v4 = vmul.f32 0.03125, %v1125_v8 }
0x1183   :  { %v1128_v5 = vpop.xlane.xlu0 %1127 }
0x1184   :  { %v1131_v6 = vsub.f32 %v2243_v55, %v1129_v4  ;;  %v1130_v38 = vmul.f32 0.03125, %v1128_v5 }
0x1186   :  { %v1132_v7 = vsub.f32 %v2246_v63, %v1130_v38  ;;  %v1133_v9 = vmul.f32 %v1131_v6, %v1131_v6  ;;  %v1244_v38 = vrot.slane %v2170_v3, %v620_v32 }
0x1188   :  { %v1135_v43 = vsel %vm87_vm0, %v1133_v9, 0.0  ;;  %v1134_v10 = vmul.f32 %v1132_v7, %v1132_v7 }
0x1189   :  { %1136 = vadd.xlane.f32.xlu0 %v1135_v43 }
0x118a   :  { %v1138_v11 = vsel %vm87_vm0, %v1134_v10, 0.0 }
0x118b   :  { %1139 = vadd.xlane.f32.xlu1 %v1138_v11 }
0x1216   :  { %v1137_v16 = vpop.xlane.xlu0 %1136 }
0x1217   :  { %v1141_v17 = vmul.f32 0.03125, %v1137_v16 }
0x1218   :  { %v1140_v19 = vpop.xlane.xlu1 %1139 }
0x1219   :  { %v1143_v20 = vadd.f32 1e-05, %v1141_v17  ;;  %v1142_v21 = vmul.f32 0.03125, %v1140_v19 }
0x121b   :  { %1768 = vrsqrt.f32 %v1143_v20  ;;  %v1144_v22 = vadd.f32 1e-05, %v1142_v21 }
0x121d   :  { %1770 = vrsqrt.f32 %v1144_v22 }
0x1225   :  { %v1769_v27 = vpop.eup %1768 }
0x1226   :  { %v1147_v0 = vmul.f32 %v1769_v27, %v1131_v6 }
0x1227   :  { %v1771_v29 = vpop.eup %1770 }
0x1228   :  { %v1153_v28 = vmul.f32 %v1152_v23, %v1147_v0  ;;  %v1148_v39 = vmul.f32 %v1771_v29, %v1132_v7  ;;  %v1719_v29 = vld [vmem:[%s2331_s5 + $0x8] sm:$0xff]  }
0x122a   :  { %v1154_v31 = vmul.f32 %v1152_v23, %v1148_v39  ;;  %v1159_v33 = vadd.f32 %v1158_v1, %v1153_v28 }
0x122c   :  { %v1160_v34 = vadd.f32 %v1158_v1, %v1154_v31 }
0x122e   :  { %v1161_v35 = vpack.c.bf16 %v1160_v34, %v1159_v33 }
0x1230   :  { %1647 = vmatmul.mubr.msk.bf16.vlgmr.msra.gmra.mrb[24].mxu1 %vm87_vm0, %v1161_v35  ;;  %v1316_v35 = vld [vmem:[#allocation7 + $0x10] sm:$0xff] }
0x1231   :  { %1666 = vmatprep.mubr.msk.bf16.mxu1 %vm1880_vm1, %v1879_v15  ;;  %v1346_v36 = vrot.slane %v1316_v35, %v2004_v25 }
0x1303   :  { %v1215_v45 = vpop.f32.mrb[24].mxu1 }
0x1304   :  { %v1216_v46 = vadd.f32 %v1215_v45, %v1165_v41  ;;  %v1648_v26 = vpop.f32.mrb[25].mxu1 }
0x1305   :  { %v1218_v48 = vpop.f32.mrb[26].mxu1 }
0x1306   :  { %v1222_v47 = vmul.f32 %v1216_v46, %v1216_v46  ;;  %v1219_v49 = vadd.f32 %v1218_v48, %v1165_v41  ;;  %v1649_v14 = vpop.f32.mrb[27].mxu1 }
0x1308   :  { %v1224_v50 = vmul.f32 %v1222_v47, %v1216_v46  ;;  %v1223_v51 = vmul.f32 %v1219_v49, %v1219_v49 }
0x130a   :  { %v1226_v18 = vmul.f32 0.044715, %v1224_v50  ;;  %v1225_v52 = vmul.f32 %v1223_v51, %v1219_v49 }
0x130c   :  { %v1228_v53 = vadd.f32 %v1226_v18, %v1216_v46  ;;  %v1227_v54 = vmul.f32 0.044715, %v1225_v52 }
0x130e   :  { %v1230_v56 = vmul.f32 0.7978846, %v1228_v53  ;;  %v1229_v58 = vadd.f32 %v1227_v54, %v1219_v49 }
0x1310   :  { %1772 = vtanh.f32 %v1230_v56  ;;  %v1231_v59 = vmul.f32 0.7978846, %v1229_v58 }
0x1312   :  { %1774 = vtanh.f32 %v1231_v59 }
0x131a   :  { %v1773_v60 = vpop.eup %1772 }
0x131b   :  { %v1234_v61 = vadd.f32 1.0, %v1773_v60 }
0x131c   :  { %v1775_v62 = vpop.eup %1774 }
0x131d   :  { %v1236_v57 = vmul.f32 0.5, %v1234_v61  ;;  %v1235_v2 = vadd.f32 1.0, %v1775_v62 }
0x131f   :  { %v1237_v8 = vmul.f32 0.5, %v1235_v2  ;;  %v1238_v4 = vmul.f32 %v1236_v57, %v1216_v46  ;;  %v1352_v46 = vrot.slane %v1316_v35, %v2011_v30 }
0x1321   :  { %v1239_v5 = vmul.f32 %v1237_v8, %v1219_v49  ;;  %v1363_v49 = vrot.slane %v1316_v35, %v2110_v42 }
0x1323   :  { %v1240_v6 = vpack.c.bf16 %v1239_v5, %v1238_v4 }
0x1325   :  { %1659 = vmatmul.mubr.msk.bf16.vlgmr.msra.gmra.mrb[32].mxu0 %vm646_vm3, %v1240_v6 }
0x13f8   :  { %v1306_v7 = vpop.f32.mrb[32].mxu0 }
0x13f9   :  { %v1307_v9 = vadd.f32 %v1306_v7, %v1244_v38  ;;  %v1660_v43 = vpop.f32.mrb[33].mxu0 }
0x13fa   :  { %v1309_v10 = vpop.f32.mrb[34].mxu0 }
0x13fb   :  { %v1310_v11 = vadd.f32 %v1309_v10, %v1244_v38  ;;  %v1661_v12 = vpop.f32.mrb[35].mxu0  ;;  %v1313_v13 = vadd.f32 %v1307_v9, %v2243_v55 }
0x13fd   :  { %v1317_v16 = vsel %vm87_vm0, %v1313_v13, 0.0  ;;  %v1314_v17 = vadd.f32 %v1310_v11, %v2246_v63  ;;  %v1718_v63 = vld [vmem:[%s2331_s5] sm:$0xff]   ;;  %s1887_s5 = smov [#allocation8]  }
0x13fe   :  { %1318 = vadd.xlane.f32.xlu0 %v1317_v16  ;;  %1663 = vmatpush3.bf16.msra.mxu1 %v1718_v63  ;;  %s1427_s0 = sshll.u32 %s1887_s5, 4  ;;  %s1428_s0 = int_to_ptr.vmem [resolvable:$true] %s1427_s0 }
0x13ff   :  { %v1320_v19 = vsel %vm87_vm0, %v1314_v17, 0.0  ;;  %1664 = vmatprep.subr.bf16.mxu1 %v1879_v15  ;;  %s1846_s24 = scalar_lea.vmem %s1428_s0, 256  ;;  %p1851_p11 = scmp.lt.s32.totalorder %s1428_s0, %s1428_s0 }
0x1400   :  { %1321 = vadd.xlane.f32.xlu1 %v1320_v19  ;;  %p1847_p10 = scmp.ne.s32.totalorder %s1428_s0, %s1846_s24  ;;  %p1852_p12 = scmp.lt.s32.totalorder %s1846_s24, %s1846_s24 }
0x1402   :  { %1665 = vmatpush3.bf16.msra.mxu1 %v1719_v29  ;;  %p1853_p13 = por %p1852_p12, %p1851_p11 }
0x1404   :  { %p1854_p0 = pnand %p1853_p13, %p1847_p10 }
0x148b   :  { %v1319_v20 = vpop.xlane.xlu0 %1318 }
0x148c   :  { %v1323_v24 = vmul.f32 0.03125, %v1319_v20 }
0x148d   :  { %v1322_v21 = vpop.xlane.xlu1 %1321 }
0x148e   :  { %v1325_v32 = vsub.f32 %v1313_v13, %v1323_v24  ;;  %v1324_v3 = vmul.f32 0.03125, %v1322_v21 }
0x1490   :  { %v1326_v22 = vsub.f32 %v1314_v17, %v1324_v3  ;;  %v1327_v23 = vmul.f32 %v1325_v32, %v1325_v32 }
0x1492   :  { %v1329_v27 = vsel %vm87_vm0, %v1327_v23, 0.0  ;;  %v1328_v0 = vmul.f32 %v1326_v22, %v1326_v22 }
0x1493   :  { %1330 = vadd.xlane.f32.xlu0 %v1329_v27 }
0x1494   :  { %v1332_v55 = vsel %vm87_vm0, %v1328_v0, 0.0 }
0x1495   :  { %1333 = vadd.xlane.f32.xlu1 %v1332_v55 }
0x1520   :  { %v1331_v28 = vpop.xlane.xlu0 %1330 }
0x1521   :  { %v1335_v39 = vmul.f32 0.03125, %v1331_v28 }
0x1522   :  { %v1334_v1 = vpop.xlane.xlu1 %1333 }
0x1523   :  { %v1337_v31 = vadd.f32 1e-05, %v1335_v39  ;;  %v1336_v33 = vmul.f32 0.03125, %v1334_v1 }
0x1525   :  { %1776 = vrsqrt.f32 %v1337_v31  ;;  %v1338_v34 = vadd.f32 1e-05, %v1336_v33 }
0x1527   :  { %1778 = vrsqrt.f32 %v1338_v34 }
0x152f   :  { %v1777_v44 = vpop.eup %1776 }
0x1530   :  { %v1341_v37 = vmul.f32 %v1777_v44, %v1325_v32 }
0x1531   :  { %v1779_v40 = vpop.eup %1778 }
0x1532   :  { %v1347_v41 = vmul.f32 %v1346_v36, %v1341_v37  ;;  %v1342_v45 = vmul.f32 %v1779_v40, %v1326_v22 }
0x1534   :  { %v1348_v15 = vmul.f32 %v1346_v36, %v1342_v45  ;;  %v1353_v26 = vadd.f32 %v1352_v46, %v1347_v41 }
0x1536   :  { %v1354_v48 = vadd.f32 %v1352_v46, %v1348_v15 }
0x1538   :  { %v1355_v47 = vpack.c.bf16 %v1354_v48, %v1353_v26 }
0x153a   :  { %1667 = vmatmul.mubr.msk.bf16.vlgmr.msra.gmra.mrb[28].mxu1 %vm87_vm0, %v1355_v47 }
0x160d   :  { %v1413_v14 = vpop.f32.mrb[28].mxu1 }
0x160e   :  { %v1414_v50 = vadd.f32 %v1413_v14, %v1363_v49  ;;  %v1668_v25 = vpop.f32.mrb[29].mxu1 }
0x160f   :  { %v1416_v51 = vpop.f32.mrb[30].mxu1 }
0x1610   :  { %1420 = vst [vmem:[#allocation8] sm:$0xff] %v1414_v50  ;;  %v1417_v18 = vadd.f32 %v1416_v51, %v1363_v49  ;;  %v1669_v52 = vpop.f32.mrb[31].mxu1 }
0x1612   :  { %1421 = vst [vmem:[#allocation8 + $0x8] sm:$0xff] %v1417_v18 }
0x1613   :  { %1857 = shalt.err (!%p1854_p0)
}
0x1614   :  { %s1858_s12 = scalar_lea.hbm %s2332_s6, 256 }
0x1615   :  { %p1859_p1 = scmp.ne.s32.totalorder %s2332_s6, %s1858_s12  ;;  %p1862_p2 = scmp.lt.u32.totalorder %s1858_s12, %s2332_s6 }
0x1617   :  { %p1864_p3 = pnand %p1862_p2, %p1859_p1 }
0x1619   :  { %1867 = shalt.err (!%p1864_p3)
}
0x161a   :  { %1433 = dma.vmem_to_hbm [thread:$0]  %s1428_s0, 256, %s2332_s6, [#allocation4], %s1876_s9, %s1876_s9, %s1877_s10  }
0x161b   :  { %1872 = dma.done.wait [#allocation4], 256  }
0x161c   :  { %1873 = vsyncadd [#allocation4], 4294967040 }
0x161d   :  { %1437 = vsyncpa [#allocation3], 1 }
0x161e   :  { %1438 = vsyncpa [#allocation6], 1 }
0x161f   :  { %1439 = vsyncpa [#allocation4], 1 }

</bundles_post_ra>
